<compile_context>
chip_gen: v7x
topology: tpu7x:2x2x1
jax: 0.10.0
libtpu: 0.0.40
codegen_flags: <defaults>
</compile_context>

<pallas_src>
import jax
import jax.numpy as jnp
from jax.experimental import pallas as pl
from jax.experimental.pallas import tpu as pltpu  # noqa: F401  (TPU backend assumed)

# ----------------------------- configuration --------------------------------
B            = 2
CHANNELS     = 1
VOLUME_SIZE  = (8, 8, 8)          # (depth, height, width)
PATCH_SIZE   = (4, 4, 4)
DIM          = 48                 # divisible by 6 -> no pos-emb padding needed
DEPTH        = 2
HEADS        = 4
DIM_HEAD     = 16
MLP_DIM      = 96
NUM_CLASSES  = 10

PD, PH, PW   = PATCH_SIZE
GD, GH, GW   = (VOLUME_SIZE[0] // PD, VOLUME_SIZE[1] // PH, VOLUME_SIZE[2] // PW)
N_TOKENS     = GD * GH * GW                   # 8
PATCH_DIM    = CHANNELS * PD * PH * PW        # 64
INNER_DIM    = HEADS * DIM_HEAD               # 64
SCALE        = DIM_HEAD ** -0.5
LN_EPS       = 1e-5
BN           = B * N_TOKENS                   # 16 rows fed to the MXU
HEAD_PAD     = 128                            # lane-dense classifier output
LANES        = 128                            # packed-operand width

# ---- f32 constants array row layout (all rows lane-padded to 128) ----------
C_PE      = 0                     # rows [0, BN): tiled sincos pos-emb (DIM lanes)
C_PLN_G   = BN                    # patch LayerNorm gamma (PATCH_DIM lanes)
C_PLN_B   = BN + 1                # patch LayerNorm beta
C_EMB_B   = BN + 2                # patch-embed Linear bias (DIM lanes)
C_LN2_G   = BN + 3                # post-embed LayerNorm gamma
C_LN2_B   = BN + 4                # post-embed LayerNorm beta
C_LAYER   = BN + 5                # per-layer base, 6 rows each:
#   +0 attn_ln_g  +1 attn_ln_b  +2 ff_ln_g  +3 ff_ln_b  +4 b1 (MLP lanes)  +5 b2
C_FINAL_G = C_LAYER + 6 * DEPTH   # final LayerNorm gamma
C_FINAL_B = C_FINAL_G + 1         # final LayerNorm beta
C_HEAD_B  = C_FINAL_G + 2         # classifier bias (padded to 128 lanes)
C_ROWS    = C_FINAL_G + 3         # = 36

# ---- bf16 weight slab row layout (all blocks lane-padded to 128) ------------
W_EMB      = 0                                     # (PATCH_DIM, DIM)
W_LAYER    = PATCH_DIM                             # per-layer base
#   +0                       : qkv, (HEADS*DIM, 3*DIM_HEAD), per-head [q|k|v], q pre-scaled
#   +HEADS*DIM               : w_out, (INNER_DIM, DIM)
#   +HEADS*DIM+INNER_DIM     : w1,    (DIM, MLP_DIM)
#   +HEADS*DIM+INNER_DIM+DIM : w2,    (MLP_DIM, DIM)
LAYER_ROWS = HEADS * DIM + INNER_DIM + DIM + MLP_DIM   # 400
W_HEAD     = W_LAYER + DEPTH * LAYER_ROWS              # classifier weight (DIM, 128)
W_ROWS     = W_HEAD + DIM                              # 912


# ----------------------------- math helpers ---------------------------------
def _erf(x, recip=None):
    # Abramowitz & Stegun 7.1.26 (|err| < 1.5e-7); only exp/mul/add (+ one
    # reciprocal, optionally pushed to the EUP inside the kernel).
    p = 0.3275911
    a1, a2, a3, a4, a5 = (0.254829592, -0.284496736, 1.421413741,
                          -1.453152027, 1.061405429)
    s = jnp.where(x >= 0.0, 1.0, -1.0)
    ax = jnp.abs(x)
    den = 1.0 + p * ax
    t = recip(den) if recip is not None else 1.0 / den
    poly = ((((a5 * t + a4) * t + a3) * t + a2) * t + a1) * t
    return s * (1.0 - poly * jnp.exp(-ax * ax))


def _gelu(x, recip=None):
    # erf-based GELU approximation, matching torch.nn.GELU() defaults closely
    return 0.5 * x * (1.0 + _erf(x * (2.0 ** -0.5), recip=recip))


def _layernorm(x, gamma, beta):
    mu = jnp.mean(x, axis=-1, keepdims=True)
    var = jnp.mean(jnp.square(x - mu), axis=-1, keepdims=True)
    return (x - mu) * jax.lax.rsqrt(var + LN_EPS) * gamma + beta


# ----------------------------- fused Pallas kernel ---------------------------
def _vit_kernel(patches_ref, consts_ref, wslab_ref, o_ref):
    f32, bf16 = jnp.float32, jnp.bfloat16
    recip = lambda v: pl.reciprocal(v, approx=True)

    def cvec(row, n):                       # (1, n) f32 constant row
        return consts_ref[row:row + 1, 0:n]

    def wmat(row, r, c):                    # (r, c) bf16 weight block (static slice)
        return wslab_ref[row:row + r, 0:c]

    def mm(a, w):                           # bf16 MXU matmul, f32 accumulation
        return jnp.dot(a.astype(bf16), w, preferred_element_type=f32)

    # ---- patch embedding: LN -> Linear -> LN, then sincos pos-emb add ----
    p = patches_ref[...]                                              # (BN, PATCH_DIM) f32
    h = _layernorm(p, cvec(C_PLN_G, PATCH_DIM), cvec(C_PLN_B, PATCH_DIM))
    h = mm(h, wmat(W_EMB, PATCH_DIM, DIM)) + cvec(C_EMB_B, DIM)
    x = _layernorm(h, cvec(C_LN2_G, DIM), cvec(C_LN2_B, DIM)) \
        + consts_ref[C_PE:C_PE + BN, 0:DIM]                           # (BN, DIM) f32

    # ---- transformer layers (static unrolled; DEPTH = 2) ----
    for l in range(DEPTH):
        crow = C_LAYER + 6 * l
        wrow = W_LAYER + LAYER_ROWS * l

        # -- attention block (pre-LN, residual) --
        h = _layernorm(x, cvec(crow + 0, DIM), cvec(crow + 1, DIM))
        hg = jnp.broadcast_to(h.astype(bf16)[None], (HEADS, BN, DIM))     # (H, BN, DIM)
        wqkv = wmat(wrow, HEADS * DIM, 3 * DIM_HEAD)                      # (H*DIM, 3*Dh)
        wqkv = wqkv.reshape(HEADS, DIM, 3 * DIM_HEAD)                     # leading-dim reshape
        # one head-batched QKV projection (q columns pre-scaled by DIM_HEAD**-0.5)
        qkv = jnp.einsum('gnc,gck->gnk', hg, wqkv,
                         preferred_element_type=f32)                      # (H, BN, 3*Dh)
        # split q/k/v (static lane slices) and fold batch into the head axis
        # via vreg-aligned leading/sublane reshapes (no transposes): g = h*B + b
        q = qkv[:, :, 0:DIM_HEAD].reshape(HEADS * B, N_TOKENS, DIM_HEAD)
        k = qkv[:, :, DIM_HEAD:2 * DIM_HEAD].reshape(HEADS * B, N_TOKENS, DIM_HEAD)
        v = qkv[:, :, 2 * DIM_HEAD:3 * DIM_HEAD].reshape(HEADS * B, N_TOKENS, DIM_HEAD)

        dots = jnp.einsum('gnd,gmd->gnm', q.astype(bf16), k.astype(bf16),
                          preferred_element_type=f32)                     # (H*B, N, N)
        e = jnp.exp(dots - jnp.max(dots, axis=-1, keepdims=True))
        attn = e / jnp.sum(e, axis=-1, keepdims=True)                     # f32 softmax
        ctx = jnp.einsum('gnm,gmd->gnd', attn.astype(bf16), v.astype(bf16),
                         preferred_element_type=f32)                      # (H*B, N, Dh)

        # merge (h, b, n) -> (h, b*N + n) (vreg-aligned), join heads on lanes,
        # then ONE output-projection matmul.
        ctx4 = ctx.reshape(HEADS, BN, DIM_HEAD)                           # (H, BN, Dh)
        o = jnp.concatenate([ctx4[hh] for hh in range(HEADS)], axis=-1)   # (BN, INNER)
        x = x + mm(o, wmat(wrow + HEADS * DIM, INNER_DIM, DIM))

        # -- feed-forward block (pre-LN, residual) --
        h = _layernorm(x, cvec(crow + 2, DIM), cvec(crow + 3, DIM))
        h = mm(h, wmat(wrow + HEADS * DIM + INNER_DIM, DIM, MLP_DIM)) \
            + cvec(crow + 4, MLP_DIM)
        h = _gelu(h, recip=recip)
        x = x + mm(h, wmat(wrow + HEADS * DIM + INNER_DIM + DIM, MLP_DIM, DIM)) \
            + cvec(crow + 5, DIM)

    # ---- final transformer LN, mean pool over tokens, classifier head ----
    x = _layernorm(x, cvec(C_FINAL_G, DIM), cvec(C_FINAL_B, DIM))
    m = jnp.mean(x.reshape(B, N_TOKENS, DIM), axis=1)                     # (B, DIM)
    o_ref[...] = mm(m, wmat(W_HEAD, DIM, HEAD_PAD)) + cvec(C_HEAD_B, HEAD_PAD)


# ----------------------------- plain-JAX glue --------------------------------
def posemb_sincos_3d(f, h, w, dim, temperature=10000.0):
    z, y, x = jnp.meshgrid(jnp.arange(f), jnp.arange(h), jnp.arange(w), indexing="ij")
    fourier_dim = dim // 6
    omega = jnp.arange(fourier_dim, dtype=jnp.float32) / (fourier_dim - 1)
    omega = 1.0 / (temperature ** omega)
    z = z.reshape(-1)[:, None] * omega[None, :]
    y = y.reshape(-1)[:, None] * omega[None, :]
    x = x.reshape(-1)[:, None] * omega[None, :]
    pe = jnp.concatenate(
        (jnp.sin(x), jnp.cos(x), jnp.sin(y), jnp.cos(y), jnp.sin(z), jnp.cos(z)), axis=1)
    pad = dim - fourier_dim * 6
    if pad:
        pe = jnp.pad(pe, ((0, 0), (0, pad)))
    return pe.astype(jnp.float32)


def to_patches(volume):
    # 'b c (d pd) (h ph) (w pw) -> b (d h w) (pd ph pw c)'
    b = volume.shape[0]
    x = volume.reshape(b, CHANNELS, GD, PD, GH, PH, GW, PW)
    x = x.transpose(0, 2, 4, 6, 3, 5, 7, 1)       # b d h w pd ph pw c
    return x.reshape(b, N_TOKENS, PATCH_DIM)


def pack_params(params):
    """Pack everything into 2 kernel operands: f32 consts (C_ROWS,128) and a
    bf16 weight slab (W_ROWS,128)."""
    pp, fp, layers = params["patch"], params["final"], params["layers"]

    def row(vec):                                    # (1, LANES) f32 row
        v = jnp.asarray(vec, jnp.float32).reshape(1, -1)
        return jnp.pad(v, ((0, 0), (0, LANES - v.shape[1])))

    def block(w):                                    # lane-pad a matrix to 128
        w = jnp.asarray(w, jnp.float32)
        return jnp.pad(w, ((0, 0), (0, LANES - w.shape[1])))

    # ---- constants: tiled pos-emb + all small vectors ----
    pe = jnp.tile(posemb_sincos_3d(GD, GH, GW, DIM), (B, 1))          # (BN, DIM)
    rows = [jnp.pad(pe, ((0, 0), (0, LANES - DIM)))]
    rows += [row(pp["ln1_g"]), row(pp["ln1_b"]), row(pp["b_emb"]),
             row(pp["ln2_g"]), row(pp["ln2_b"])]
    for lp in layers:
        rows += [row(lp["attn_ln_g"]), row(lp["attn_ln_b"]),
                 row(lp["ff_ln_g"]), row(lp["ff_ln_b"]),
                 row(lp["b1"]), row(lp["b2"])]
    rows += [row(fp["ln_g"]), row(fp["ln_b"]), row(fp["b_head"])]
    consts = jnp.concatenate(rows, axis=0)                            # (C_ROWS, 128)
    assert consts.shape == (C_ROWS, LANES)

    # ---- bf16 weight slab ----
    blocks = [block(pp["w_emb"])]
    for lp in layers:
        wq, wk, wv = jnp.split(lp["w_qkv"], 3, axis=1)                # (DIM, INNER) each
        per_head = []
        for hh in range(HEADS):
            sl = slice(hh * DIM_HEAD, (hh + 1) * DIM_HEAD)
            per_head.append(jnp.concatenate(
                [wq[:, sl] * SCALE, wk[:, sl], wv[:, sl]], axis=1))   # (DIM, 3*Dh)
        blocks.append(block(jnp.concatenate(per_head, axis=0)))       # (HEADS*DIM, 48)
        blocks += [block(lp["w_out"]), block(lp["w1"]), block(lp["w2"])]
    blocks.append(block(fp["w_head"]))                                # (DIM, 128)
    wslab = jnp.concatenate(blocks, axis=0).astype(jnp.bfloat16)      # (W_ROWS, 128)
    assert wslab.shape == (W_ROWS, LANES)

    return {"consts": consts, "wslab": wslab}


@jax.jit
def simple_vit_forward(volume, packed):
    patches = to_patches(volume).reshape(BN, PATCH_DIM)
    out = pl.pallas_call(
        _vit_kernel,
        out_shape=jax.ShapeDtypeStruct((B, HEAD_PAD), jnp.float32),
    )(patches, packed["consts"], packed["wslab"])
    return out[:, :NUM_CLASSES]


# ----------------------------- parameters ------------------------------------
def init_params(key):
    keys = iter(jax.random.split(key, 4 + DEPTH * 6))

    def dense(shape, scale=0.02):
        return (scale * jax.random.normal(next(keys), shape)).astype(jnp.float32)

    params = {
        "patch": {
            "ln1_g": jnp.ones((1, PATCH_DIM), jnp.float32),
            "ln1_b": jnp.zeros((1, PATCH_DIM), jnp.float32),
            "w_emb": dense((PATCH_DIM, DIM)),
            "b_emb": dense((1, DIM)),
            "ln2_g": jnp.ones((1, DIM), jnp.float32),
            "ln2_b": jnp.zeros((1, DIM), jnp.float32),
        },
        "layers": [],
        "final": {
            "ln_g": jnp.ones((1, DIM), jnp.float32),
            "ln_b": jnp.zeros((1, DIM), jnp.float32),
            "w_head": dense((DIM, NUM_CLASSES)),
            "b_head": dense((1, NUM_CLASSES)),
        },
    }
    for _ in range(DEPTH):
        params["layers"].append({
            "attn_ln_g": jnp.ones((1, DIM), jnp.float32),
            "attn_ln_b": jnp.zeros((1, DIM), jnp.float32),
            "w_qkv": dense((DIM, 3 * INNER_DIM)),     # to_qkv (bias=False)
            "w_out": dense((INNER_DIM, DIM)),         # to_out (bias=False)
            "ff_ln_g": jnp.ones((1, DIM), jnp.float32),
            "ff_ln_b": jnp.zeros((1, DIM), jnp.float32),
            "w1": dense((DIM, MLP_DIM)),
            "b1": dense((1, MLP_DIM)),
            "w2": dense((MLP_DIM, DIM)),
            "b2": dense((1, DIM)),
        })
    return params


# ----------------------------- pure-JAX reference ----------------------------
def ref_forward(volume, params):
    patches = to_patches(volume)
    pe = posemb_sincos_3d(GD, GH, GW, DIM)
    pp = params["patch"]
    x = _layernorm(patches, pp["ln1_g"], pp["ln1_b"])
    x = x @ pp["w_emb"] + pp["b_emb"]
    x = _layernorm(x, pp["ln2_g"], pp["ln2_b"])
    x = x + pe[None]
    for lp in params["layers"]:
        h = _layernorm(x, lp["attn_ln_g"], lp["attn_ln_b"])
        qkv = h @ lp["w_qkv"]
        q, k, v = jnp.split(qkv, 3, axis=-1)
        hds = lambda t: t.reshape(B, N_TOKENS, HEADS, DIM_HEAD).transpose(0, 2, 1, 3)
        q, k, v = hds(q), hds(k), hds(v)
        dots = jnp.einsum("bhnd,bhmd->bhnm", q, k) * SCALE
        attn = jax.nn.softmax(dots, axis=-1)
        out = jnp.einsum("bhnm,bhmd->bhnd", attn, v)
        out = out.transpose(0, 2, 1, 3).reshape(B, N_TOKENS, INNER_DIM)
        x = x + out @ lp["w_out"]
        h = _layernorm(x, lp["ff_ln_g"], lp["ff_ln_b"])
        h = _gelu(h @ lp["w1"] + lp["b1"])
        x = x + h @ lp["w2"] + lp["b2"]
    fp = params["final"]
    x = _layernorm(x, fp["ln_g"], fp["ln_b"])
    x = x.mean(axis=1)
    return x @ fp["w_head"] + fp["b_head"]


# ----------------------------- main -------------------------------------------
if __name__ == "__main__":
    key = jax.random.PRNGKey(0)
    pkey, vkey = jax.random.split(key)
    params = init_params(pkey)
    packed = pack_params(params)
    volume = jax.random.normal(vkey, (B, CHANNELS) + VOLUME_SIZE, dtype=jnp.float32)

    logits = jax.block_until_ready(simple_vit_forward(volume, packed))
    assert logits.shape == (B, NUM_CLASSES)
    assert bool(jnp.all(jnp.isfinite(logits)))

    ref = ref_forward(volume, params)
    assert bool(jnp.allclose(logits, ref, atol=5e-2, rtol=5e-2)), \
        f"max abs diff = {float(jnp.max(jnp.abs(logits - ref)))}"

    print("KERNEL_OK")
</pallas_src>

<mosaic_0001>
module attributes {stable_mosaic.version = 11 : i64} {
  func.func @_vit_kernel(%arg0: memref<16x64xf32, #tpu.memory_space<vmem>>, %arg1: memref<36x128xf32, #tpu.memory_space<vmem>>, %arg2: memref<912x128xbf16, #tpu.memory_space<vmem>>, %arg3: memref<2x128xf32, #tpu.memory_space<vmem>>) attributes {dimension_semantics = [], scalar_prefetch = 0 : i64, scratch_operands = 0 : i64, tpu.core_type = #tpu.core_type<tc>} {
    %c0 = arith.constant 0 : index
    %c0_0 = arith.constant 0 : index
    %0 = vector.load %arg0[%c0, %c0_0] : memref<16x64xf32, #tpu.memory_space<vmem>>, vector<16x64xf32>
    %c16 = arith.constant 16 : index
    %c0_1 = arith.constant 0 : index
    %1 = vector.load %arg1[%c16, %c0_1] : memref<36x128xf32, #tpu.memory_space<vmem>>, vector<1x64xf32>
    %c17 = arith.constant 17 : index
    %c0_2 = arith.constant 0 : index
    %2 = vector.load %arg1[%c17, %c0_2] : memref<36x128xf32, #tpu.memory_space<vmem>>, vector<1x64xf32>
    %cst = arith.constant dense<0.000000e+00> : vector<16xf32>
    %3 = vector.multi_reduction <add>, %0, %cst [1] : vector<16x64xf32> to vector<16xf32>
    %4 = vector.shape_cast %3 : vector<16xf32> to vector<16x1xf32>
    %cst_3 = arith.constant 6.400000e+01 : f32
    %5 = vector.broadcast %cst_3 : f32 to vector<16x1xf32>
    %6 = arith.divf %4, %5 : vector<16x1xf32>
    %7 = vector.broadcast %6 : vector<16x1xf32> to vector<16x64xf32>
    %8 = arith.subf %0, %7 : vector<16x64xf32>
    %9 = arith.mulf %8, %8 : vector<16x64xf32>
    %cst_4 = arith.constant dense<0.000000e+00> : vector<16xf32>
    %10 = vector.multi_reduction <add>, %9, %cst_4 [1] : vector<16x64xf32> to vector<16xf32>
    %11 = vector.shape_cast %10 : vector<16xf32> to vector<16x1xf32>
    %cst_5 = arith.constant 6.400000e+01 : f32
    %12 = vector.broadcast %cst_5 : f32 to vector<16x1xf32>
    %13 = arith.divf %11, %12 : vector<16x1xf32>
    %14 = vector.broadcast %6 : vector<16x1xf32> to vector<16x64xf32>
    %15 = arith.subf %0, %14 : vector<16x64xf32>
    %cst_6 = arith.constant 9.99999974E-6 : f32
    %16 = vector.broadcast %cst_6 : f32 to vector<16x1xf32>
    %17 = arith.addf %13, %16 : vector<16x1xf32>
    %18 = math.rsqrt %17 : vector<16x1xf32>
    %19 = vector.broadcast %18 : vector<16x1xf32> to vector<16x64xf32>
    %20 = arith.mulf %15, %19 : vector<16x64xf32>
    %21 = vector.broadcast %1 : vector<1x64xf32> to vector<16x64xf32>
    %22 = arith.mulf %20, %21 : vector<16x64xf32>
    %23 = vector.broadcast %2 : vector<1x64xf32> to vector<16x64xf32>
    %24 = arith.addf %22, %23 : vector<16x64xf32>
    %c0_7 = arith.constant 0 : index
    %c0_8 = arith.constant 0 : index
    %25 = vector.load %arg2[%c0_7, %c0_8] : memref<912x128xbf16, #tpu.memory_space<vmem>>, vector<64x48xbf16>
    %26 = arith.truncf %24 : vector<16x64xf32> to vector<16x64xbf16>
    %cst_9 = arith.constant dense<0.000000e+00> : vector<16x48xf32>
    %27 = tpu.matmul %26, %25, %cst_9 {dimension_numbers = #tpu.dot_dimension_numbers<[1], [0], [0], [1], [0, 0, 1, 1], [], []>} : vector<16x64xbf16>, vector<64x48xbf16>, vector<16x48xf32> -> vector<16x48xf32>
    %c18 = arith.constant 18 : index
    %c0_10 = arith.constant 0 : index
    %28 = vector.load %arg1[%c18, %c0_10] : memref<36x128xf32, #tpu.memory_space<vmem>>, vector<1x48xf32>
    %29 = vector.broadcast %28 : vector<1x48xf32> to vector<16x48xf32>
    %30 = arith.addf %27, %29 : vector<16x48xf32>
    %c19 = arith.constant 19 : index
    %c0_11 = arith.constant 0 : index
    %31 = vector.load %arg1[%c19, %c0_11] : memref<36x128xf32, #tpu.memory_space<vmem>>, vector<1x48xf32>
    %c20 = arith.constant 20 : index
    %c0_12 = arith.constant 0 : index
    %32 = vector.load %arg1[%c20, %c0_12] : memref<36x128xf32, #tpu.memory_space<vmem>>, vector<1x48xf32>
    %cst_13 = arith.constant dense<0.000000e+00> : vector<16xf32>
    %33 = vector.multi_reduction <add>, %30, %cst_13 [1] : vector<16x48xf32> to vector<16xf32>
    %34 = vector.shape_cast %33 : vector<16xf32> to vector<16x1xf32>
    %cst_14 = arith.constant 4.800000e+01 : f32
    %35 = vector.broadcast %cst_14 : f32 to vector<16x1xf32>
    %36 = arith.divf %34, %35 : vector<16x1xf32>
    %37 = vector.broadcast %36 : vector<16x1xf32> to vector<16x48xf32>
    %38 = arith.subf %30, %37 : vector<16x48xf32>
    %39 = arith.mulf %38, %38 : vector<16x48xf32>
    %cst_15 = arith.constant dense<0.000000e+00> : vector<16xf32>
    %40 = vector.multi_reduction <add>, %39, %cst_15 [1] : vector<16x48xf32> to vector<16xf32>
    %41 = vector.shape_cast %40 : vector<16xf32> to vector<16x1xf32>
    %cst_16 = arith.constant 4.800000e+01 : f32
    %42 = vector.broadcast %cst_16 : f32 to vector<16x1xf32>
    %43 = arith.divf %41, %42 : vector<16x1xf32>
    %44 = vector.broadcast %36 : vector<16x1xf32> to vector<16x48xf32>
    %45 = arith.subf %30, %44 : vector<16x48xf32>
    %cst_17 = arith.constant 9.99999974E-6 : f32
    %46 = vector.broadcast %cst_17 : f32 to vector<16x1xf32>
    %47 = arith.addf %43, %46 : vector<16x1xf32>
    %48 = math.rsqrt %47 : vector<16x1xf32>
    %49 = vector.broadcast %48 : vector<16x1xf32> to vector<16x48xf32>
    %50 = arith.mulf %45, %49 : vector<16x48xf32>
    %51 = vector.broadcast %31 : vector<1x48xf32> to vector<16x48xf32>
    %52 = arith.mulf %50, %51 : vector<16x48xf32>
    %53 = vector.broadcast %32 : vector<1x48xf32> to vector<16x48xf32>
    %54 = arith.addf %52, %53 : vector<16x48xf32>
    %c0_18 = arith.constant 0 : index
    %c0_19 = arith.constant 0 : index
    %55 = vector.load %arg1[%c0_18, %c0_19] : memref<36x128xf32, #tpu.memory_space<vmem>>, vector<16x48xf32>
    %56 = arith.addf %54, %55 : vector<16x48xf32>
    %c21 = arith.constant 21 : index
    %c0_20 = arith.constant 0 : index
    %57 = vector.load %arg1[%c21, %c0_20] : memref<36x128xf32, #tpu.memory_space<vmem>>, vector<1x48xf32>
    %c22 = arith.constant 22 : index
    %c0_21 = arith.constant 0 : index
    %58 = vector.load %arg1[%c22, %c0_21] : memref<36x128xf32, #tpu.memory_space<vmem>>, vector<1x48xf32>
    %cst_22 = arith.constant dense<0.000000e+00> : vector<16xf32>
    %59 = vector.multi_reduction <add>, %56, %cst_22 [1] : vector<16x48xf32> to vector<16xf32>
    %60 = vector.shape_cast %59 : vector<16xf32> to vector<16x1xf32>
    %cst_23 = arith.constant 4.800000e+01 : f32
    %61 = vector.broadcast %cst_23 : f32 to vector<16x1xf32>
    %62 = arith.divf %60, %61 : vector<16x1xf32>
    %63 = vector.broadcast %62 : vector<16x1xf32> to vector<16x48xf32>
    %64 = arith.subf %56, %63 : vector<16x48xf32>
    %65 = arith.mulf %64, %64 : vector<16x48xf32>
    %cst_24 = arith.constant dense<0.000000e+00> : vector<16xf32>
    %66 = vector.multi_reduction <add>, %65, %cst_24 [1] : vector<16x48xf32> to vector<16xf32>
    %67 = vector.shape_cast %66 : vector<16xf32> to vector<16x1xf32>
    %cst_25 = arith.constant 4.800000e+01 : f32
    %68 = vector.broadcast %cst_25 : f32 to vector<16x1xf32>
    %69 = arith.divf %67, %68 : vector<16x1xf32>
    %70 = vector.broadcast %62 : vector<16x1xf32> to vector<16x48xf32>
    %71 = arith.subf %56, %70 : vector<16x48xf32>
    %cst_26 = arith.constant 9.99999974E-6 : f32
    %72 = vector.broadcast %cst_26 : f32 to vector<16x1xf32>
    %73 = arith.addf %69, %72 : vector<16x1xf32>
    %74 = math.rsqrt %73 : vector<16x1xf32>
    %75 = vector.broadcast %74 : vector<16x1xf32> to vector<16x48xf32>
    %76 = arith.mulf %71, %75 : vector<16x48xf32>
    %77 = vector.broadcast %57 : vector<1x48xf32> to vector<16x48xf32>
    %78 = arith.mulf %76, %77 : vector<16x48xf32>
    %79 = vector.broadcast %58 : vector<1x48xf32> to vector<16x48xf32>
    %80 = arith.addf %78, %79 : vector<16x48xf32>
    %81 = arith.truncf %80 : vector<16x48xf32> to vector<16x48xbf16>
    %82 = vector.shape_cast %81 : vector<16x48xbf16> to vector<1x16x48xbf16>
    %83 = vector.shape_cast %82 : vector<1x16x48xbf16> to vector<1x16x48xbf16>
    %84 = vector.broadcast %83 : vector<1x16x48xbf16> to vector<4x16x48xbf16>
    %c64 = arith.constant 64 : index
    %c0_27 = arith.constant 0 : index
    %85 = vector.load %arg2[%c64, %c0_27] : memref<912x128xbf16, #tpu.memory_space<vmem>>, vector<192x48xbf16>
    %86 = vector.shape_cast %85 : vector<192x48xbf16> to vector<4x48x48xbf16>
    "tpu.trace_start"() <{level = 10 : i32, message = "gnc,gck->gnk"}> : () -> ()
    %cst_28 = arith.constant dense<0.000000e+00> : vector<4x16x48xf32>
    %87 = tpu.matmul %84, %86, %cst_28 {dimension_numbers = #tpu.dot_dimension_numbers<[2], [1], [1], [2], [0, 0, 0, 1, 1, 2], [0], [0]>} : vector<4x16x48xbf16>, vector<4x48x48xbf16>, vector<4x16x48xf32> -> vector<4x16x48xf32>
    "tpu.trace_stop"() : () -> ()
    %88 = vector.extract_strided_slice %87 {offsets = [0, 0, 0], sizes = [4, 16, 16], strides = [1, 1, 1]} : vector<4x16x48xf32> to vector<4x16x16xf32>
    %89 = vector.shape_cast %88 : vector<4x16x16xf32> to vector<8x8x16xf32>
    %90 = vector.extract_strided_slice %87 {offsets = [0, 0, 16], sizes = [4, 16, 16], strides = [1, 1, 1]} : vector<4x16x48xf32> to vector<4x16x16xf32>
    %91 = vector.shape_cast %90 : vector<4x16x16xf32> to vector<8x8x16xf32>
    %92 = vector.extract_strided_slice %87 {offsets = [0, 0, 32], sizes = [4, 16, 16], strides = [1, 1, 1]} : vector<4x16x48xf32> to vector<4x16x16xf32>
    %93 = vector.shape_cast %92 : vector<4x16x16xf32> to vector<8x8x16xf32>
    %94 = arith.truncf %89 : vector<8x8x16xf32> to vector<8x8x16xbf16>
    %95 = arith.truncf %91 : vector<8x8x16xf32> to vector<8x8x16xbf16>
    "tpu.trace_start"() <{level = 10 : i32, message = "gnd,gmd->gnm"}> : () -> ()
    %cst_29 = arith.constant dense<0.000000e+00> : vector<8x8x8xf32>
    %96 = tpu.matmul %94, %95, %cst_29 {dimension_numbers = #tpu.dot_dimension_numbers<[2], [2], [1], [1], [0, 0, 0, 1, 1, 1], [0], [0]>} : vector<8x8x16xbf16>, vector<8x8x16xbf16>, vector<8x8x8xf32> -> vector<8x8x8xf32>
    "tpu.trace_stop"() : () -> ()
    %cst_30 = arith.constant dense<0xFF800000> : vector<8x8xf32>
    %97 = vector.multi_reduction <maximumf>, %96, %cst_30 [2] : vector<8x8x8xf32> to vector<8x8xf32>
    %98 = vector.shape_cast %97 : vector<8x8xf32> to vector<8x8x1xf32>
    %99 = vector.broadcast %98 : vector<8x8x1xf32> to vector<8x8x8xf32>
    %100 = arith.subf %96, %99 : vector<8x8x8xf32>
    %101 = math.exp %100 : vector<8x8x8xf32>
    %cst_31 = arith.constant dense<0.000000e+00> : vector<8x8xf32>
    %102 = vector.multi_reduction <add>, %101, %cst_31 [2] : vector<8x8x8xf32> to vector<8x8xf32>
    %103 = vector.shape_cast %102 : vector<8x8xf32> to vector<8x8x1xf32>
    %104 = vector.broadcast %103 : vector<8x8x1xf32> to vector<8x8x8xf32>
    %105 = arith.divf %101, %104 : vector<8x8x8xf32>
    %106 = arith.truncf %105 : vector<8x8x8xf32> to vector<8x8x8xbf16>
    %107 = arith.truncf %93 : vector<8x8x16xf32> to vector<8x8x16xbf16>
    "tpu.trace_start"() <{level = 10 : i32, message = "gnm,gmd->gnd"}> : () -> ()
    %cst_32 = arith.constant dense<0.000000e+00> : vector<8x8x16xf32>
    %108 = tpu.matmul %106, %107, %cst_32 {dimension_numbers = #tpu.dot_dimension_numbers<[2], [1], [1], [2], [0, 0, 0, 1, 1, 2], [0], [0]>} : vector<8x8x8xbf16>, vector<8x8x16xbf16>, vector<8x8x16xf32> -> vector<8x8x16xf32>
    "tpu.trace_stop"() : () -> ()
    %109 = vector.shape_cast %108 : vector<8x8x16xf32> to vector<4x16x16xf32>
    %110 = vector.extract_strided_slice %109 {offsets = [0, 0, 0], sizes = [1, 16, 16], strides = [1, 1, 1]} : vector<4x16x16xf32> to vector<1x16x16xf32>
    %111 = vector.shape_cast %110 : vector<1x16x16xf32> to vector<16x16xf32>
    %112 = vector.extract_strided_slice %109 {offsets = [1, 0, 0], sizes = [1, 16, 16], strides = [1, 1, 1]} : vector<4x16x16xf32> to vector<1x16x16xf32>
    %113 = vector.shape_cast %112 : vector<1x16x16xf32> to vector<16x16xf32>
    %114 = vector.extract_strided_slice %109 {offsets = [2, 0, 0], sizes = [1, 16, 16], strides = [1, 1, 1]} : vector<4x16x16xf32> to vector<1x16x16xf32>
    %115 = vector.shape_cast %114 : vector<1x16x16xf32> to vector<16x16xf32>
    %116 = vector.extract_strided_slice %109 {offsets = [3, 0, 0], sizes = [1, 16, 16], strides = [1, 1, 1]} : vector<4x16x16xf32> to vector<1x16x16xf32>
    %117 = vector.shape_cast %116 : vector<1x16x16xf32> to vector<16x16xf32>
    %118 = tpu.concatenate %111, %113, %115, %117 in 1 : vector<16x16xf32>, vector<16x16xf32>, vector<16x16xf32>, vector<16x16xf32> -> vector<16x64xf32>
    %c256 = arith.constant 256 : index
    %c0_33 = arith.constant 0 : index
    %119 = vector.load %arg2[%c256, %c0_33] : memref<912x128xbf16, #tpu.memory_space<vmem>>, vector<64x48xbf16>
    %120 = arith.truncf %118 : vector<16x64xf32> to vector<16x64xbf16>
    %cst_34 = arith.constant dense<0.000000e+00> : vector<16x48xf32>
    %121 = tpu.matmul %120, %119, %cst_34 {dimension_numbers = #tpu.dot_dimension_numbers<[1], [0], [0], [1], [0, 0, 1, 1], [], []>} : vector<16x64xbf16>, vector<64x48xbf16>, vector<16x48xf32> -> vector<16x48xf32>
    %122 = arith.addf %56, %121 : vector<16x48xf32>
    %c23 = arith.constant 23 : index
    %c0_35 = arith.constant 0 : index
    %123 = vector.load %arg1[%c23, %c0_35] : memref<36x128xf32, #tpu.memory_space<vmem>>, vector<1x48xf32>
    %c24 = arith.constant 24 : index
    %c0_36 = arith.constant 0 : index
    %124 = vector.load %arg1[%c24, %c0_36] : memref<36x128xf32, #tpu.memory_space<vmem>>, vector<1x48xf32>
    %cst_37 = arith.constant dense<0.000000e+00> : vector<16xf32>
    %125 = vector.multi_reduction <add>, %122, %cst_37 [1] : vector<16x48xf32> to vector<16xf32>
    %126 = vector.shape_cast %125 : vector<16xf32> to vector<16x1xf32>
    %cst_38 = arith.constant 4.800000e+01 : f32
    %127 = vector.broadcast %cst_38 : f32 to vector<16x1xf32>
    %128 = arith.divf %126, %127 : vector<16x1xf32>
    %129 = vector.broadcast %128 : vector<16x1xf32> to vector<16x48xf32>
    %130 = arith.subf %122, %129 : vector<16x48xf32>
    %131 = arith.mulf %130, %130 : vector<16x48xf32>
    %cst_39 = arith.constant dense<0.000000e+00> : vector<16xf32>
    %132 = vector.multi_reduction <add>, %131, %cst_39 [1] : vector<16x48xf32> to vector<16xf32>
    %133 = vector.shape_cast %132 : vector<16xf32> to vector<16x1xf32>
    %cst_40 = arith.constant 4.800000e+01 : f32
    %134 = vector.broadcast %cst_40 : f32 to vector<16x1xf32>
    %135 = arith.divf %133, %134 : vector<16x1xf32>
    %136 = vector.broadcast %128 : vector<16x1xf32> to vector<16x48xf32>
    %137 = arith.subf %122, %136 : vector<16x48xf32>
    %cst_41 = arith.constant 9.99999974E-6 : f32
    %138 = vector.broadcast %cst_41 : f32 to vector<16x1xf32>
    %139 = arith.addf %135, %138 : vector<16x1xf32>
    %140 = math.rsqrt %139 : vector<16x1xf32>
    %141 = vector.broadcast %140 : vector<16x1xf32> to vector<16x48xf32>
    %142 = arith.mulf %137, %141 : vector<16x48xf32>
    %143 = vector.broadcast %123 : vector<1x48xf32> to vector<16x48xf32>
    %144 = arith.mulf %142, %143 : vector<16x48xf32>
    %145 = vector.broadcast %124 : vector<1x48xf32> to vector<16x48xf32>
    %146 = arith.addf %144, %145 : vector<16x48xf32>
    %c320 = arith.constant 320 : index
    %c0_42 = arith.constant 0 : index
    %147 = vector.load %arg2[%c320, %c0_42] : memref<912x128xbf16, #tpu.memory_space<vmem>>, vector<48x96xbf16>
    %148 = arith.truncf %146 : vector<16x48xf32> to vector<16x48xbf16>
    %cst_43 = arith.constant dense<0.000000e+00> : vector<16x96xf32>
    %149 = tpu.matmul %148, %147, %cst_43 {dimension_numbers = #tpu.dot_dimension_numbers<[1], [0], [0], [1], [0, 0, 1, 1], [], []>} : vector<16x48xbf16>, vector<48x96xbf16>, vector<16x96xf32> -> vector<16x96xf32>
    %c25 = arith.constant 25 : index
    %c0_44 = arith.constant 0 : index
    %150 = vector.load %arg1[%c25, %c0_44] : memref<36x128xf32, #tpu.memory_space<vmem>>, vector<1x96xf32>
    %151 = vector.broadcast %150 : vector<1x96xf32> to vector<16x96xf32>
    %152 = arith.addf %149, %151 : vector<16x96xf32>
    %cst_45 = arith.constant 5.000000e-01 : f32
    %153 = vector.broadcast %cst_45 : f32 to vector<16x96xf32>
    %154 = arith.mulf %153, %152 : vector<16x96xf32>
    %cst_46 = arith.constant 0.707106769 : f32
    %155 = vector.broadcast %cst_46 : f32 to vector<16x96xf32>
    %156 = arith.mulf %152, %155 : vector<16x96xf32>
    %cst_47 = arith.constant 0.000000e+00 : f32
    %157 = vector.broadcast %cst_47 : f32 to vector<16x96xf32>
    %158 = arith.cmpf oge, %156, %157 : vector<16x96xf32>
    %cst_48 = arith.constant 1.000000e+00 : f32
    %cst_49 = arith.constant -1.000000e+00 : f32
    %159 = vector.broadcast %cst_48 : f32 to vector<16x96xf32>
    %160 = vector.broadcast %cst_49 : f32 to vector<16x96xf32>
    %161 = arith.select %158, %159, %160 : vector<16x96xi1>, vector<16x96xf32>
    %162 = math.absf %156 : vector<16x96xf32>
    %cst_50 = arith.constant 0.327591091 : f32
    %163 = vector.broadcast %cst_50 : f32 to vector<16x96xf32>
    %164 = arith.mulf %163, %162 : vector<16x96xf32>
    %cst_51 = arith.constant 1.000000e+00 : f32
    %165 = vector.broadcast %cst_51 : f32 to vector<16x96xf32>
    %166 = arith.addf %165, %164 : vector<16x96xf32>
    %167 = tpu.reciprocal %166 {approx = true} : vector<16x96xf32> -> vector<16x96xf32>
    %cst_52 = arith.constant 1.06140542 : f32
    %168 = vector.broadcast %cst_52 : f32 to vector<16x96xf32>
    %169 = arith.mulf %168, %167 : vector<16x96xf32>
    %cst_53 = arith.constant -1.45315206 : f32
    %170 = vector.broadcast %cst_53 : f32 to vector<16x96xf32>
    %171 = arith.addf %169, %170 : vector<16x96xf32>
    %172 = arith.mulf %171, %167 : vector<16x96xf32>
    %cst_54 = arith.constant 1.42141378 : f32
    %173 = vector.broadcast %cst_54 : f32 to vector<16x96xf32>
    %174 = arith.addf %172, %173 : vector<16x96xf32>
    %175 = arith.mulf %174, %167 : vector<16x96xf32>
    %cst_55 = arith.constant -0.284496725 : f32
    %176 = vector.broadcast %cst_55 : f32 to vector<16x96xf32>
    %177 = arith.addf %175, %176 : vector<16x96xf32>
    %178 = arith.mulf %177, %167 : vector<16x96xf32>
    %cst_56 = arith.constant 0.254829586 : f32
    %179 = vector.broadcast %cst_56 : f32 to vector<16x96xf32>
    %180 = arith.addf %178, %179 : vector<16x96xf32>
    %181 = arith.mulf %180, %167 : vector<16x96xf32>
    %cst_57 = arith.constant 0.000000e+00 : f32
    %182 = vector.broadcast %cst_57 : f32 to vector<16x96xf32>
    %183 = arith.subf %182, %162 : vector<16x96xf32>
    %184 = arith.mulf %183, %162 : vector<16x96xf32>
    %185 = math.exp %184 : vector<16x96xf32>
    %186 = arith.mulf %181, %185 : vector<16x96xf32>
    %cst_58 = arith.constant 1.000000e+00 : f32
    %187 = vector.broadcast %cst_58 : f32 to vector<16x96xf32>
    %188 = arith.subf %187, %186 : vector<16x96xf32>
    %189 = arith.mulf %161, %188 : vector<16x96xf32>
    %cst_59 = arith.constant 1.000000e+00 : f32
    %190 = vector.broadcast %cst_59 : f32 to vector<16x96xf32>
    %191 = arith.addf %190, %189 : vector<16x96xf32>
    %192 = arith.mulf %154, %191 : vector<16x96xf32>
    %c368 = arith.constant 368 : index
    %c0_60 = arith.constant 0 : index
    %193 = vector.load %arg2[%c368, %c0_60] : memref<912x128xbf16, #tpu.memory_space<vmem>>, vector<96x48xbf16>
    %194 = arith.truncf %192 : vector<16x96xf32> to vector<16x96xbf16>
    %cst_61 = arith.constant dense<0.000000e+00> : vector<16x48xf32>
    %195 = tpu.matmul %194, %193, %cst_61 {dimension_numbers = #tpu.dot_dimension_numbers<[1], [0], [0], [1], [0, 0, 1, 1], [], []>} : vector<16x96xbf16>, vector<96x48xbf16>, vector<16x48xf32> -> vector<16x48xf32>
    %196 = arith.addf %122, %195 : vector<16x48xf32>
    %c26 = arith.constant 26 : index
    %c0_62 = arith.constant 0 : index
    %197 = vector.load %arg1[%c26, %c0_62] : memref<36x128xf32, #tpu.memory_space<vmem>>, vector<1x48xf32>
    %198 = vector.broadcast %197 : vector<1x48xf32> to vector<16x48xf32>
    %199 = arith.addf %196, %198 : vector<16x48xf32>
    %c27 = arith.constant 27 : index
    %c0_63 = arith.constant 0 : index
    %200 = vector.load %arg1[%c27, %c0_63] : memref<36x128xf32, #tpu.memory_space<vmem>>, vector<1x48xf32>
    %c28 = arith.constant 28 : index
    %c0_64 = arith.constant 0 : index
    %201 = vector.load %arg1[%c28, %c0_64] : memref<36x128xf32, #tpu.memory_space<vmem>>, vector<1x48xf32>
    %cst_65 = arith.constant dense<0.000000e+00> : vector<16xf32>
    %202 = vector.multi_reduction <add>, %199, %cst_65 [1] : vector<16x48xf32> to vector<16xf32>
    %203 = vector.shape_cast %202 : vector<16xf32> to vector<16x1xf32>
    %cst_66 = arith.constant 4.800000e+01 : f32
    %204 = vector.broadcast %cst_66 : f32 to vector<16x1xf32>
    %205 = arith.divf %203, %204 : vector<16x1xf32>
    %206 = vector.broadcast %205 : vector<16x1xf32> to vector<16x48xf32>
    %207 = arith.subf %199, %206 : vector<16x48xf32>
    %208 = arith.mulf %207, %207 : vector<16x48xf32>
    %cst_67 = arith.constant dense<0.000000e+00> : vector<16xf32>
    %209 = vector.multi_reduction <add>, %208, %cst_67 [1] : vector<16x48xf32> to vector<16xf32>
    %210 = vector.shape_cast %209 : vector<16xf32> to vector<16x1xf32>
    %cst_68 = arith.constant 4.800000e+01 : f32
    %211 = vector.broadcast %cst_68 : f32 to vector<16x1xf32>
    %212 = arith.divf %210, %211 : vector<16x1xf32>
    %213 = vector.broadcast %205 : vector<16x1xf32> to vector<16x48xf32>
    %214 = arith.subf %199, %213 : vector<16x48xf32>
    %cst_69 = arith.constant 9.99999974E-6 : f32
    %215 = vector.broadcast %cst_69 : f32 to vector<16x1xf32>
    %216 = arith.addf %212, %215 : vector<16x1xf32>
    %217 = math.rsqrt %216 : vector<16x1xf32>
    %218 = vector.broadcast %217 : vector<16x1xf32> to vector<16x48xf32>
    %219 = arith.mulf %214, %218 : vector<16x48xf32>
    %220 = vector.broadcast %200 : vector<1x48xf32> to vector<16x48xf32>
    %221 = arith.mulf %219, %220 : vector<16x48xf32>
    %222 = vector.broadcast %201 : vector<1x48xf32> to vector<16x48xf32>
    %223 = arith.addf %221, %222 : vector<16x48xf32>
    %224 = arith.truncf %223 : vector<16x48xf32> to vector<16x48xbf16>
    %225 = vector.shape_cast %224 : vector<16x48xbf16> to vector<1x16x48xbf16>
    %226 = vector.shape_cast %225 : vector<1x16x48xbf16> to vector<1x16x48xbf16>
    %227 = vector.broadcast %226 : vector<1x16x48xbf16> to vector<4x16x48xbf16>
    %c464 = arith.constant 464 : index
    %c0_70 = arith.constant 0 : index
    %228 = vector.load %arg2[%c464, %c0_70] : memref<912x128xbf16, #tpu.memory_space<vmem>>, vector<192x48xbf16>
    %229 = vector.shape_cast %228 : vector<192x48xbf16> to vector<4x48x48xbf16>
    "tpu.trace_start"() <{level = 10 : i32, message = "gnc,gck->gnk"}> : () -> ()
    %cst_71 = arith.constant dense<0.000000e+00> : vector<4x16x48xf32>
    %230 = tpu.matmul %227, %229, %cst_71 {dimension_numbers = #tpu.dot_dimension_numbers<[2], [1], [1], [2], [0, 0, 0, 1, 1, 2], [0], [0]>} : vector<4x16x48xbf16>, vector<4x48x48xbf16>, vector<4x16x48xf32> -> vector<4x16x48xf32>
    "tpu.trace_stop"() : () -> ()
    %231 = vector.extract_strided_slice %230 {offsets = [0, 0, 0], sizes = [4, 16, 16], strides = [1, 1, 1]} : vector<4x16x48xf32> to vector<4x16x16xf32>
    %232 = vector.shape_cast %231 : vector<4x16x16xf32> to vector<8x8x16xf32>
    %233 = vector.extract_strided_slice %230 {offsets = [0, 0, 16], sizes = [4, 16, 16], strides = [1, 1, 1]} : vector<4x16x48xf32> to vector<4x16x16xf32>
    %234 = vector.shape_cast %233 : vector<4x16x16xf32> to vector<8x8x16xf32>
    %235 = vector.extract_strided_slice %230 {offsets = [0, 0, 32], sizes = [4, 16, 16], strides = [1, 1, 1]} : vector<4x16x48xf32> to vector<4x16x16xf32>
    %236 = vector.shape_cast %235 : vector<4x16x16xf32> to vector<8x8x16xf32>
    %237 = arith.truncf %232 : vector<8x8x16xf32> to vector<8x8x16xbf16>
    %238 = arith.truncf %234 : vector<8x8x16xf32> to vector<8x8x16xbf16>
    "tpu.trace_start"() <{level = 10 : i32, message = "gnd,gmd->gnm"}> : () -> ()
    %cst_72 = arith.constant dense<0.000000e+00> : vector<8x8x8xf32>
    %239 = tpu.matmul %237, %238, %cst_72 {dimension_numbers = #tpu.dot_dimension_numbers<[2], [2], [1], [1], [0, 0, 0, 1, 1, 1], [0], [0]>} : vector<8x8x16xbf16>, vector<8x8x16xbf16>, vector<8x8x8xf32> -> vector<8x8x8xf32>
    "tpu.trace_stop"() : () -> ()
    %cst_73 = arith.constant dense<0xFF800000> : vector<8x8xf32>
    %240 = vector.multi_reduction <maximumf>, %239, %cst_73 [2] : vector<8x8x8xf32> to vector<8x8xf32>
    %241 = vector.shape_cast %240 : vector<8x8xf32> to vector<8x8x1xf32>
    %242 = vector.broadcast %241 : vector<8x8x1xf32> to vector<8x8x8xf32>
    %243 = arith.subf %239, %242 : vector<8x8x8xf32>
    %244 = math.exp %243 : vector<8x8x8xf32>
    %cst_74 = arith.constant dense<0.000000e+00> : vector<8x8xf32>
    %245 = vector.multi_reduction <add>, %244, %cst_74 [2] : vector<8x8x8xf32> to vector<8x8xf32>
    %246 = vector.shape_cast %245 : vector<8x8xf32> to vector<8x8x1xf32>
    %247 = vector.broadcast %246 : vector<8x8x1xf32> to vector<8x8x8xf32>
    %248 = arith.divf %244, %247 : vector<8x8x8xf32>
    %249 = arith.truncf %248 : vector<8x8x8xf32> to vector<8x8x8xbf16>
    %250 = arith.truncf %236 : vector<8x8x16xf32> to vector<8x8x16xbf16>
    "tpu.trace_start"() <{level = 10 : i32, message = "gnm,gmd->gnd"}> : () -> ()
    %cst_75 = arith.constant dense<0.000000e+00> : vector<8x8x16xf32>
    %251 = tpu.matmul %249, %250, %cst_75 {dimension_numbers = #tpu.dot_dimension_numbers<[2], [1], [1], [2], [0, 0, 0, 1, 1, 2], [0], [0]>} : vector<8x8x8xbf16>, vector<8x8x16xbf16>, vector<8x8x16xf32> -> vector<8x8x16xf32>
    "tpu.trace_stop"() : () -> ()
    %252 = vector.shape_cast %251 : vector<8x8x16xf32> to vector<4x16x16xf32>
    %253 = vector.extract_strided_slice %252 {offsets = [0, 0, 0], sizes = [1, 16, 16], strides = [1, 1, 1]} : vector<4x16x16xf32> to vector<1x16x16xf32>
    %254 = vector.shape_cast %253 : vector<1x16x16xf32> to vector<16x16xf32>
    %255 = vector.extract_strided_slice %252 {offsets = [1, 0, 0], sizes = [1, 16, 16], strides = [1, 1, 1]} : vector<4x16x16xf32> to vector<1x16x16xf32>
    %256 = vector.shape_cast %255 : vector<1x16x16xf32> to vector<16x16xf32>
    %257 = vector.extract_strided_slice %252 {offsets = [2, 0, 0], sizes = [1, 16, 16], strides = [1, 1, 1]} : vector<4x16x16xf32> to vector<1x16x16xf32>
    %258 = vector.shape_cast %257 : vector<1x16x16xf32> to vector<16x16xf32>
    %259 = vector.extract_strided_slice %252 {offsets = [3, 0, 0], sizes = [1, 16, 16], strides = [1, 1, 1]} : vector<4x16x16xf32> to vector<1x16x16xf32>
    %260 = vector.shape_cast %259 : vector<1x16x16xf32> to vector<16x16xf32>
    %261 = tpu.concatenate %254, %256, %258, %260 in 1 : vector<16x16xf32>, vector<16x16xf32>, vector<16x16xf32>, vector<16x16xf32> -> vector<16x64xf32>
    %c656 = arith.constant 656 : index
    %c0_76 = arith.constant 0 : index
    %262 = vector.load %arg2[%c656, %c0_76] : memref<912x128xbf16, #tpu.memory_space<vmem>>, vector<64x48xbf16>
    %263 = arith.truncf %261 : vector<16x64xf32> to vector<16x64xbf16>
    %cst_77 = arith.constant dense<0.000000e+00> : vector<16x48xf32>
    %264 = tpu.matmul %263, %262, %cst_77 {dimension_numbers = #tpu.dot_dimension_numbers<[1], [0], [0], [1], [0, 0, 1, 1], [], []>} : vector<16x64xbf16>, vector<64x48xbf16>, vector<16x48xf32> -> vector<16x48xf32>
    %265 = arith.addf %199, %264 : vector<16x48xf32>
    %c29 = arith.constant 29 : index
    %c0_78 = arith.constant 0 : index
    %266 = vector.load %arg1[%c29, %c0_78] : memref<36x128xf32, #tpu.memory_space<vmem>>, vector<1x48xf32>
    %c30 = arith.constant 30 : index
    %c0_79 = arith.constant 0 : index
    %267 = vector.load %arg1[%c30, %c0_79] : memref<36x128xf32, #tpu.memory_space<vmem>>, vector<1x48xf32>
    %cst_80 = arith.constant dense<0.000000e+00> : vector<16xf32>
    %268 = vector.multi_reduction <add>, %265, %cst_80 [1] : vector<16x48xf32> to vector<16xf32>
    %269 = vector.shape_cast %268 : vector<16xf32> to vector<16x1xf32>
    %cst_81 = arith.constant 4.800000e+01 : f32
    %270 = vector.broadcast %cst_81 : f32 to vector<16x1xf32>
    %271 = arith.divf %269, %270 : vector<16x1xf32>
    %272 = vector.broadcast %271 : vector<16x1xf32> to vector<16x48xf32>
    %273 = arith.subf %265, %272 : vector<16x48xf32>
    %274 = arith.mulf %273, %273 : vector<16x48xf32>
    %cst_82 = arith.constant dense<0.000000e+00> : vector<16xf32>
    %275 = vector.multi_reduction <add>, %274, %cst_82 [1] : vector<16x48xf32> to vector<16xf32>
    %276 = vector.shape_cast %275 : vector<16xf32> to vector<16x1xf32>
    %cst_83 = arith.constant 4.800000e+01 : f32
    %277 = vector.broadcast %cst_83 : f32 to vector<16x1xf32>
    %278 = arith.divf %276, %277 : vector<16x1xf32>
    %279 = vector.broadcast %271 : vector<16x1xf32> to vector<16x48xf32>
    %280 = arith.subf %265, %279 : vector<16x48xf32>
    %cst_84 = arith.constant 9.99999974E-6 : f32
    %281 = vector.broadcast %cst_84 : f32 to vector<16x1xf32>
    %282 = arith.addf %278, %281 : vector<16x1xf32>
    %283 = math.rsqrt %282 : vector<16x1xf32>
    %284 = vector.broadcast %283 : vector<16x1xf32> to vector<16x48xf32>
    %285 = arith.mulf %280, %284 : vector<16x48xf32>
    %286 = vector.broadcast %266 : vector<1x48xf32> to vector<16x48xf32>
    %287 = arith.mulf %285, %286 : vector<16x48xf32>
    %288 = vector.broadcast %267 : vector<1x48xf32> to vector<16x48xf32>
    %289 = arith.addf %287, %288 : vector<16x48xf32>
    %c720 = arith.constant 720 : index
    %c0_85 = arith.constant 0 : index
    %290 = vector.load %arg2[%c720, %c0_85] : memref<912x128xbf16, #tpu.memory_space<vmem>>, vector<48x96xbf16>
    %291 = arith.truncf %289 : vector<16x48xf32> to vector<16x48xbf16>
    %cst_86 = arith.constant dense<0.000000e+00> : vector<16x96xf32>
    %292 = tpu.matmul %291, %290, %cst_86 {dimension_numbers = #tpu.dot_dimension_numbers<[1], [0], [0], [1], [0, 0, 1, 1], [], []>} : vector<16x48xbf16>, vector<48x96xbf16>, vector<16x96xf32> -> vector<16x96xf32>
    %c31 = arith.constant 31 : index
    %c0_87 = arith.constant 0 : index
    %293 = vector.load %arg1[%c31, %c0_87] : memref<36x128xf32, #tpu.memory_space<vmem>>, vector<1x96xf32>
    %294 = vector.broadcast %293 : vector<1x96xf32> to vector<16x96xf32>
    %295 = arith.addf %292, %294 : vector<16x96xf32>
    %cst_88 = arith.constant 5.000000e-01 : f32
    %296 = vector.broadcast %cst_88 : f32 to vector<16x96xf32>
    %297 = arith.mulf %296, %295 : vector<16x96xf32>
    %cst_89 = arith.constant 0.707106769 : f32
    %298 = vector.broadcast %cst_89 : f32 to vector<16x96xf32>
    %299 = arith.mulf %295, %298 : vector<16x96xf32>
    %cst_90 = arith.constant 0.000000e+00 : f32
    %300 = vector.broadcast %cst_90 : f32 to vector<16x96xf32>
    %301 = arith.cmpf oge, %299, %300 : vector<16x96xf32>
    %cst_91 = arith.constant 1.000000e+00 : f32
    %cst_92 = arith.constant -1.000000e+00 : f32
    %302 = vector.broadcast %cst_91 : f32 to vector<16x96xf32>
    %303 = vector.broadcast %cst_92 : f32 to vector<16x96xf32>
    %304 = arith.select %301, %302, %303 : vector<16x96xi1>, vector<16x96xf32>
    %305 = math.absf %299 : vector<16x96xf32>
    %cst_93 = arith.constant 0.327591091 : f32
    %306 = vector.broadcast %cst_93 : f32 to vector<16x96xf32>
    %307 = arith.mulf %306, %305 : vector<16x96xf32>
    %cst_94 = arith.constant 1.000000e+00 : f32
    %308 = vector.broadcast %cst_94 : f32 to vector<16x96xf32>
    %309 = arith.addf %308, %307 : vector<16x96xf32>
    %310 = tpu.reciprocal %309 {approx = true} : vector<16x96xf32> -> vector<16x96xf32>
    %cst_95 = arith.constant 1.06140542 : f32
    %311 = vector.broadcast %cst_95 : f32 to vector<16x96xf32>
    %312 = arith.mulf %311, %310 : vector<16x96xf32>
    %cst_96 = arith.constant -1.45315206 : f32
    %313 = vector.broadcast %cst_96 : f32 to vector<16x96xf32>
    %314 = arith.addf %312, %313 : vector<16x96xf32>
    %315 = arith.mulf %314, %310 : vector<16x96xf32>
    %cst_97 = arith.constant 1.42141378 : f32
    %316 = vector.broadcast %cst_97 : f32 to vector<16x96xf32>
    %317 = arith.addf %315, %316 : vector<16x96xf32>
    %318 = arith.mulf %317, %310 : vector<16x96xf32>
    %cst_98 = arith.constant -0.284496725 : f32
    %319 = vector.broadcast %cst_98 : f32 to vector<16x96xf32>
    %320 = arith.addf %318, %319 : vector<16x96xf32>
    %321 = arith.mulf %320, %310 : vector<16x96xf32>
    %cst_99 = arith.constant 0.254829586 : f32
    %322 = vector.broadcast %cst_99 : f32 to vector<16x96xf32>
    %323 = arith.addf %321, %322 : vector<16x96xf32>
    %324 = arith.mulf %323, %310 : vector<16x96xf32>
    %cst_100 = arith.constant 0.000000e+00 : f32
    %325 = vector.broadcast %cst_100 : f32 to vector<16x96xf32>
    %326 = arith.subf %325, %305 : vector<16x96xf32>
    %327 = arith.mulf %326, %305 : vector<16x96xf32>
    %328 = math.exp %327 : vector<16x96xf32>
    %329 = arith.mulf %324, %328 : vector<16x96xf32>
    %cst_101 = arith.constant 1.000000e+00 : f32
    %330 = vector.broadcast %cst_101 : f32 to vector<16x96xf32>
    %331 = arith.subf %330, %329 : vector<16x96xf32>
    %332 = arith.mulf %304, %331 : vector<16x96xf32>
    %cst_102 = arith.constant 1.000000e+00 : f32
    %333 = vector.broadcast %cst_102 : f32 to vector<16x96xf32>
    %334 = arith.addf %333, %332 : vector<16x96xf32>
    %335 = arith.mulf %297, %334 : vector<16x96xf32>
    %c768 = arith.constant 768 : index
    %c0_103 = arith.constant 0 : index
    %336 = vector.load %arg2[%c768, %c0_103] : memref<912x128xbf16, #tpu.memory_space<vmem>>, vector<96x48xbf16>
    %337 = arith.truncf %335 : vector<16x96xf32> to vector<16x96xbf16>
    %cst_104 = arith.constant dense<0.000000e+00> : vector<16x48xf32>
    %338 = tpu.matmul %337, %336, %cst_104 {dimension_numbers = #tpu.dot_dimension_numbers<[1], [0], [0], [1], [0, 0, 1, 1], [], []>} : vector<16x96xbf16>, vector<96x48xbf16>, vector<16x48xf32> -> vector<16x48xf32>
    %339 = arith.addf %265, %338 : vector<16x48xf32>
    %c32 = arith.constant 32 : index
    %c0_105 = arith.constant 0 : index
    %340 = vector.load %arg1[%c32, %c0_105] : memref<36x128xf32, #tpu.memory_space<vmem>>, vector<1x48xf32>
    %341 = vector.broadcast %340 : vector<1x48xf32> to vector<16x48xf32>
    %342 = arith.addf %339, %341 : vector<16x48xf32>
    %c33 = arith.constant 33 : index
    %c0_106 = arith.constant 0 : index
    %343 = vector.load %arg1[%c33, %c0_106] : memref<36x128xf32, #tpu.memory_space<vmem>>, vector<1x48xf32>
    %c34 = arith.constant 34 : index
    %c0_107 = arith.constant 0 : index
    %344 = vector.load %arg1[%c34, %c0_107] : memref<36x128xf32, #tpu.memory_space<vmem>>, vector<1x48xf32>
    %cst_108 = arith.constant dense<0.000000e+00> : vector<16xf32>
    %345 = vector.multi_reduction <add>, %342, %cst_108 [1] : vector<16x48xf32> to vector<16xf32>
    %346 = vector.shape_cast %345 : vector<16xf32> to vector<16x1xf32>
    %cst_109 = arith.constant 4.800000e+01 : f32
    %347 = vector.broadcast %cst_109 : f32 to vector<16x1xf32>
    %348 = arith.divf %346, %347 : vector<16x1xf32>
    %349 = vector.broadcast %348 : vector<16x1xf32> to vector<16x48xf32>
    %350 = arith.subf %342, %349 : vector<16x48xf32>
    %351 = arith.mulf %350, %350 : vector<16x48xf32>
    %cst_110 = arith.constant dense<0.000000e+00> : vector<16xf32>
    %352 = vector.multi_reduction <add>, %351, %cst_110 [1] : vector<16x48xf32> to vector<16xf32>
    %353 = vector.shape_cast %352 : vector<16xf32> to vector<16x1xf32>
    %cst_111 = arith.constant 4.800000e+01 : f32
    %354 = vector.broadcast %cst_111 : f32 to vector<16x1xf32>
    %355 = arith.divf %353, %354 : vector<16x1xf32>
    %356 = vector.broadcast %348 : vector<16x1xf32> to vector<16x48xf32>
    %357 = arith.subf %342, %356 : vector<16x48xf32>
    %cst_112 = arith.constant 9.99999974E-6 : f32
    %358 = vector.broadcast %cst_112 : f32 to vector<16x1xf32>
    %359 = arith.addf %355, %358 : vector<16x1xf32>
    %360 = math.rsqrt %359 : vector<16x1xf32>
    %361 = vector.broadcast %360 : vector<16x1xf32> to vector<16x48xf32>
    %362 = arith.mulf %357, %361 : vector<16x48xf32>
    %363 = vector.broadcast %343 : vector<1x48xf32> to vector<16x48xf32>
    %364 = arith.mulf %362, %363 : vector<16x48xf32>
    %365 = vector.broadcast %344 : vector<1x48xf32> to vector<16x48xf32>
    %366 = arith.addf %364, %365 : vector<16x48xf32>
    %367 = vector.shape_cast %366 : vector<16x48xf32> to vector<2x8x48xf32>
    %cst_113 = arith.constant dense<0.000000e+00> : vector<2x48xf32>
    %368 = vector.multi_reduction <add>, %367, %cst_113 [1] : vector<2x8x48xf32> to vector<2x48xf32>
    %cst_114 = arith.constant 8.000000e+00 : f32
    %369 = vector.broadcast %cst_114 : f32 to vector<2x48xf32>
    %370 = arith.divf %368, %369 : vector<2x48xf32>
    %c864 = arith.constant 864 : index
    %c0_115 = arith.constant 0 : index
    %371 = vector.load %arg2[%c864, %c0_115] : memref<912x128xbf16, #tpu.memory_space<vmem>>, vector<48x128xbf16>
    %372 = arith.truncf %370 : vector<2x48xf32> to vector<2x48xbf16>
    %cst_116 = arith.constant dense<0.000000e+00> : vector<2x128xf32>
    %373 = tpu.matmul %372, %371, %cst_116 {dimension_numbers = #tpu.dot_dimension_numbers<[1], [0], [0], [1], [0, 0, 1, 1], [], []>} : vector<2x48xbf16>, vector<48x128xbf16>, vector<2x128xf32> -> vector<2x128xf32>
    %c35 = arith.constant 35 : index
    %c0_117 = arith.constant 0 : index
    %374 = vector.load %arg1[%c35, %c0_117] : memref<36x128xf32, #tpu.memory_space<vmem>>, vector<1x128xf32>
    %375 = vector.broadcast %374 : vector<1x128xf32> to vector<2x128xf32>
    %376 = arith.addf %373, %375 : vector<2x128xf32>
    %c0_118 = arith.constant 0 : index
    %c0_119 = arith.constant 0 : index
    %377 = vector.load %arg3[%c0_118, %c0_119] : memref<2x128xf32, #tpu.memory_space<vmem>>, vector<2x128xf32>
    tpu.vector_store %arg3[%c0_118, %c0_119], %376 {strides = array<i32>} : memref<2x128xf32, #tpu.memory_space<vmem>>, vector<2x128xf32>,
    return
  }
}

</mosaic_0001>

<bundles_post_ra>
// kernel: simple_vit_forward.1
= control target key start
LH: loop header
LB: loop body
LE: loop exit
PB: predicated region body
PF: predicated region fallthrough
CT: control target
= control target key end

     0   :  { %vm20_vm0 = vcmask 523264   ;;  %s5195_s0 = inlined_call_operand.vmem [shape: f32[16,64], index: 0, kind: input, shape index: {}]   ;;  %s5196_s1 = inlined_call_operand.vmem [shape: f32[36,128], index: 1, kind: input, shape index: {}]   ;;  %s5197_s2 = inlined_call_operand.vmem [shape: bf16[912,128], index: 2, kind: input, shape index: {}]   ;;  %s5198_s3 = inlined_call_operand.hbm [shape: f32[2,128], index: 3, kind: output, shape index: {}]  }
   0x1   :  { %v16_v0 = vld [vmem:[%s5195_s0] sm:$0xff]  ;;  %v17_v1 = vld [vmem:[%s5195_s0 + $0x8] sm:$0xff] }
   0x2   :  { %v21_v2 = vsel %vm20_vm0, %v16_v0, 0.0  ;;  %v24_v3 = vsel %vm20_vm0, %v17_v1, 0.0 }
   0x3   :  { %22 = vadd.xlane.f32.xlu0 %v21_v2 }
   0x7   :  { %25 = vadd.xlane.f32.xlu0 %v24_v3 }
   0x8   :  { %8 = vsyncpa [#allocation3], 0  ;;  %v4139_v14 = vld [vmem:[%s5197_s2] sm:$0xff]   ;;  %v4328_v15 = vmov 0.0   ;;  %v4140_v16 = vld [vmem:[%s5197_s2 + $0x8] sm:$0xff]   ;;  %vm4329_vm1 = vmmov 0  }
   0x9   :  { %3730 = vmatprep.subr.bf16.mxu0 %v4328_v15  ;;  %3742 = vmatprep.subr.bf16.mxu1 %v4328_v15  ;;  %v4141_v17 = vld [vmem:[%s5197_s2 + $0x10] sm:$0xff]   ;;  %v4142_v18 = vld [vmem:[%s5197_s2 + $0x18] sm:$0xff]   ;;  %vm144_vm2 = vcmask 392192   ;;  %s4330_s10 = smov 112   ;;  %vm503_vm3 = vcmask 130048   ;;  %vm893_vm4 = vcmask 64512  }
   0xa   :  { %3731 = vmatpush3.bf16.msra.mxu0 %v4139_v14  ;;  %3738 = vmatprep.mubr.msk.bf16.mxu0 %vm4329_vm1, %v4328_v15  ;;  %v3468_v27 = vld [vmem:[%s5196_s1 + $0x10] ss:$0 sm:$0xff]  ;;  %v3469_v31 = vld [vmem:[%s5196_s1 + $0x11] ss:$0 sm:$0xff]  ;;  %v3470_v36 = vld [vmem:[%s5196_s1 + $0x12] ss:$0 sm:$0xff] }
   0xb   :  { %3732 = vmatprep.subr.bf16.mxu0 %v4328_v15  ;;  %3748 = vmatprep.mubr.msk.bf16.mxu1 %vm4329_vm1, %v4328_v15  ;;  %v3476_v62 = vld [vmem:[%s5196_s1 + $0x13] ss:$0 sm:$0xff]  ;;  %s4331_s11 = smov 96   ;;  %vm995_vm5 = vcmask 1043456   ;;  %s4332_s14 = smov 16   ;;  %vm1401_vm6 = vcmask 261120  }
   0xc   :  { %s4333_s18 = smov 32   ;;  %s4334_s21 = smov 48   ;;  %vm1700_vm9 = vcmask 785408   ;;  %vm3389_vm12 = vcmask 1041409  }
   0xd   :  { %s4336_s17 = smov [#allocation2]  }
   0xe   :  { %3733 = vmatpush3.bf16.msra.mxu0 %v4140_v16  ;;  %s3460_s19 = sshll.u32 %s4336_s17, 4  ;;  %s3461_s19 = int_to_ptr.vmem [resolvable:$true] %s3460_s19 }
   0xf   :  { %3734 = vmatprep.subr.bf16.mxu0 %v4328_v15  ;;  %s4304_s20 = scalar_lea.vmem %s3461_s19, 32  ;;  %p4309_p1 = scmp.lt.s32.totalorder %s3461_s19, %s3461_s19 }
  0x10   :  { %p4305_p0 = scmp.ne.s32.totalorder %s3461_s19, %s4304_s20  ;;  %p4310_p2 = scmp.lt.s32.totalorder %s4304_s20, %s4304_s20 }
  0x12   :  { %3735 = vmatpush3.bf16.msra.mxu0 %v4141_v17  ;;  %p4311_p3 = por %p4310_p2, %p4309_p1 }
  0x13   :  { %3736 = vmatprep.subr.bf16.mxu0 %v4328_v15 }
  0x14   :  { %p4312_p4 = pnand %p4311_p3, %p4305_p0 }
  0x16   :  { %3737 = vmatpush3.bf16.msra.mxu0 %v4142_v18 }
  0x17   :  { %3762 = vmatprep.subr.bf16.mxu0 %v4328_v15 }
  0x90   :  { %v23_v4 = vpop.xlane.xlu0 %22 }
  0x91   :  { %v28_v5 = vmul.f32 0.015625, %v23_v4  ;;  %v184_v4 = vld [vmem:[%s5196_s1] sm:$0xff] }
  0x93   :  { %v30_v6 = vsub.f32 %v16_v0, %v28_v5 }
  0x94   :  { %v26_v7 = vpop.xlane.xlu0 %25 }
  0x95   :  { %v29_v8 = vmul.f32 0.015625, %v26_v7  ;;  %v32_v9 = vmul.f32 %v30_v6, %v30_v6  ;;  %v185_v7 = vld [vmem:[%s5196_s1 + $0x8] sm:$0xff] }
  0x97   :  { %v31_v10 = vsub.f32 %v17_v1, %v29_v8  ;;  %v34_v11 = vsel %vm20_vm0, %v32_v9, 0.0  ;;  %v3477_v1 = vld [vmem:[%s5196_s1 + $0x14] ss:$0 sm:$0xff] }
  0x98   :  { %35 = vadd.xlane.f32.xlu1 %v34_v11 }
  0x99   :  { %v33_v12 = vmul.f32 %v31_v10, %v31_v10 }
  0x9b   :  { %v37_v13 = vsel %vm20_vm0, %v33_v12, 0.0 }
  0x9c   :  { %38 = vadd.xlane.f32.xlu1 %v37_v13 }
 0x125   :  { %v36_v19 = vpop.xlane.xlu1 %35 }
 0x126   :  { %v40_v20 = vmul.f32 0.015625, %v36_v19 }
 0x128   :  { %v42_v21 = vadd.f32 1e-05, %v40_v20 }
 0x129   :  { %v39_v22 = vpop.xlane.xlu1 %38 }
 0x12a   :  { %4196 = vrsqrt.f32 %v42_v21  ;;  %v41_v23 = vmul.f32 0.015625, %v39_v22 }
 0x12c   :  { %v43_v24 = vadd.f32 1e-05, %v41_v23 }
 0x12e   :  { %4198 = vrsqrt.f32 %v43_v24  ;;  %v4143_v24 = vld [vmem:[%s5197_s2 + $0x20] sm:$0xff]  }
 0x12f   :  { %3743 = vmatpush3.bf16.msra.mxu1 %v4143_v24 }
 0x130   :  { %3744 = vmatprep.subr.bf16.mxu1 %v4328_v15 }
 0x134   :  { %v4197_v25 = vpop.eup %4196 }
 0x135   :  { %v46_v26 = vmul.f32 %v4197_v25, %v30_v6  ;;  %v4144_v25 = vld [vmem:[%s5197_s2 + $0x50] sm:$0xff]  }
 0x137   :  { %v52_v30 = vmul.f32 %v3468_v27, %v46_v26  ;;  %v4145_v26 = vld [vmem:[%s5197_s2 + $0x28] sm:$0xff]  }
 0x138   :  { %v4199_v28 = vpop.eup %4198  ;;  %3745 = vmatpush3.bf16.msra.mxu1 %v4145_v26 }
 0x139   :  { %v47_v29 = vmul.f32 %v4199_v28, %v31_v10  ;;  %v58_v33 = vadd.f32 %v3469_v31, %v52_v30  ;;  %v4147_v28 = vld [vmem:[%s5197_s2 + $0x30] sm:$0xff]   ;;  %3746 = vmatprep.subr.bf16.mxu1 %v4328_v15 }
 0x13b   :  { %v53_v32 = vmul.f32 %v3468_v27, %v47_v29  ;;  %v4146_v27 = vld [vmem:[%s5197_s2 + $0x58] sm:$0xff]   ;;  %v4148_v29 = vld [vmem:[%s5197_s2 + $0x60] sm:$0xff]  }
 0x13c   :  { %3747 = vmatpush3.bf16.msra.mxu1 %v4147_v28 }
 0x13d   :  { %v59_v34 = vadd.f32 %v3469_v31, %v53_v32  ;;  %3752 = vmatprep.subr.bf16.mxu1 %v4328_v15 }
 0x13f   :  { %v68_v35 = vpack.c.bf16 %v59_v34, %v58_v33 }
 0x141   :  { %3739 = vmatmul.mubr.msk.bf16.vlgmr.msra.gmra.mrb[0].mxu0 %vm20_vm0, %v68_v35 }
 0x142   :  { %3768 = vmatprep.mubr.msk.bf16.mxu0 %vm4329_vm1, %v4328_v15  ;;  %3763 = vmatpush3.bf16.msra.mxu0 %v4144_v25 }
 0x143   :  { %3764 = vmatprep.subr.bf16.mxu0 %v4328_v15 }
 0x146   :  { %3765 = vmatpush3.bf16.msra.mxu0 %v4146_v27 }
 0x147   :  { %3766 = vmatprep.subr.bf16.mxu0 %v4328_v15 }
 0x14a   :  { %3767 = vmatpush3.bf16.msra.mxu0 %v4148_v29 }
 0x14b   :  { %3788 = vmatprep.subr.bf16.mxu0 %v4328_v15 }
 0x214   :  { %v135_v37 = vpop.f32.mrb[0].mxu0 }
 0x215   :  { %v136_v38 = vadd.f32 %v3470_v36, %v135_v37  ;;  %v3740_v39 = vpop.f32.mrb[1].mxu0  ;;  %v3478_v37 = vld [vmem:[%s5196_s1 + $0x15] ss:$0 sm:$0xff] }
 0x216   :  { %v138_v40 = vpop.f32.mrb[2].mxu0 }
 0x217   :  { %v139_v41 = vadd.f32 %v3470_v36, %v138_v40  ;;  %v3741_v42 = vpop.f32.mrb[3].mxu0  ;;  %v145_v43 = vsel %vm144_vm2, %v136_v38, 0.0 }
 0x218   :  { %146 = vadd.xlane.f32.xlu0 %v145_v43  ;;  %v3479_v42 = vld [vmem:[%s5196_s1 + $0x16] ss:$0 sm:$0xff] }
 0x219   :  { %v148_v44 = vsel %vm144_vm2, %v139_v41, 0.0 }
 0x21a   :  { %149 = vadd.xlane.f32.xlu1 %v148_v44 }
 0x2a5   :  { %v147_v45 = vpop.xlane.xlu0 %146 }
 0x2a6   :  { %v152_v46 = vmul.f32 0.020833334, %v147_v45 }
 0x2a7   :  { %v150_v47 = vpop.xlane.xlu1 %149 }
 0x2a8   :  { %v154_v48 = vsub.f32 %v136_v38, %v152_v46  ;;  %v153_v49 = vmul.f32 0.020833334, %v150_v47  ;;  %v4149_v46 = vld [vmem:[%s5197_s2 + $0x38] sm:$0xff]  }
 0x2aa   :  { %v155_v50 = vsub.f32 %v139_v41, %v153_v49  ;;  %v156_v51 = vmul.f32 %v154_v48, %v154_v48  ;;  %v4151_v49 = vld [vmem:[%s5197_s2 + $0x48] sm:$0xff]  }
 0x2ac   :  { %v158_v52 = vsel %vm144_vm2, %v156_v51, 0.0  ;;  %v157_v53 = vmul.f32 %v155_v50, %v155_v50  ;;  %v4153_v51 = vld [vmem:[%s5197_s2 + $0x70] sm:$0xff]  }
 0x2ad   :  { %159 = vadd.xlane.f32.xlu0 %v158_v52  ;;  %v4154_v52 = vld [vmem:[%s5197_s2 + $0x78] sm:$0xff]  }
 0x2ae   :  { %v161_v54 = vsel %vm144_vm2, %v157_v53, 0.0 }
 0x2af   :  { %162 = vadd.xlane.f32.xlu1 %v161_v54 }
 0x33a   :  { %v160_v55 = vpop.xlane.xlu0 %159 }
 0x33b   :  { %v164_v56 = vmul.f32 0.020833334, %v160_v55 }
 0x33c   :  { %v163_v57 = vpop.xlane.xlu1 %162 }
 0x33d   :  { %v166_v58 = vadd.f32 1e-05, %v164_v56  ;;  %v165_v59 = vmul.f32 0.020833334, %v163_v57 }
 0x33f   :  { %4200 = vrsqrt.f32 %v166_v58  ;;  %v167_v60 = vadd.f32 1e-05, %v165_v59 }
 0x341   :  { %4202 = vrsqrt.f32 %v167_v60 }
 0x349   :  { %v4201_v61 = vpop.eup %4200 }
 0x34a   :  { %v170_v63 = vmul.f32 %v4201_v61, %v154_v48  ;;  %v4150_v48 = vld [vmem:[%s5197_s2 + $0x40] sm:$0xff]  }
 0x34b   :  { %v4203_v0 = vpop.eup %4202 }
 0x34c   :  { %v176_v2 = vmul.f32 %v3476_v62, %v170_v63  ;;  %v171_v3 = vmul.f32 %v4203_v0, %v155_v50  ;;  %v4152_v50 = vld [vmem:[%s5197_s2 + $0x68] sm:$0xff]  }
 0x34e   :  { %v182_v5 = vadd.f32 %v3477_v1, %v176_v2  ;;  %v177_v6 = vmul.f32 %v3476_v62, %v171_v3 }
 0x350   :  { %v4417_v8 = vadd.f32 %v184_v4, %v182_v5  ;;  %v183_v9 = vadd.f32 %v3477_v1, %v177_v6 }
 0x352   :  { %v190_v10 = vsel %vm144_vm2, %v4417_v8, 0.0  ;;  %v4421_v11 = vadd.f32 %v185_v7, %v183_v9 }
 0x353   :  { %191 = vadd.xlane.f32.xlu0 %v190_v10 }
 0x354   :  { %v193_v12 = vsel %vm144_vm2, %v4421_v11, 0.0 }
 0x355   :  { %194 = vadd.xlane.f32.xlu1 %v193_v12 }
 0x3e0   :  { %v192_v13 = vpop.xlane.xlu0 %191 }
 0x3e1   :  { %v196_v14 = vmul.f32 0.020833334, %v192_v13 }
 0x3e2   :  { %v195_v16 = vpop.xlane.xlu1 %194 }
 0x3e3   :  { %v198_v17 = vsub.f32 %v4417_v8, %v196_v14  ;;  %v197_v18 = vmul.f32 0.020833334, %v195_v16 }
 0x3e5   :  { %v199_v19 = vsub.f32 %v4421_v11, %v197_v18  ;;  %v200_v20 = vmul.f32 %v198_v17, %v198_v17 }
 0x3e7   :  { %v202_v21 = vsel %vm144_vm2, %v200_v20, 0.0  ;;  %v201_v22 = vmul.f32 %v199_v19, %v199_v19 }
 0x3e8   :  { %203 = vadd.xlane.f32.xlu0 %v202_v21 }
 0x3e9   :  { %v205_v23 = vsel %vm144_vm2, %v201_v22, 0.0 }
 0x3ea   :  { %206 = vadd.xlane.f32.xlu1 %v205_v23 }
 0x475   :  { %v204_v30 = vpop.xlane.xlu0 %203 }
 0x476   :  { %v208_v31 = vmul.f32 0.020833334, %v204_v30 }
 0x477   :  { %v207_v32 = vpop.xlane.xlu1 %206 }
 0x478   :  { %v210_v33 = vadd.f32 1e-05, %v208_v31  ;;  %v209_v34 = vmul.f32 0.020833334, %v207_v32 }
 0x47a   :  { %4204 = vrsqrt.f32 %v210_v33  ;;  %v211_v35 = vadd.f32 1e-05, %v209_v34 }
 0x47c   :  { %4206 = vrsqrt.f32 %v211_v35 }
 0x484   :  { %v4205_v36 = vpop.eup %4204 }
 0x485   :  { %v214_v38 = vmul.f32 %v4205_v36, %v198_v17 }
 0x486   :  { %v4207_v39 = vpop.eup %4206 }
 0x487   :  { %v215_v40 = vmul.f32 %v4207_v39, %v199_v19  ;;  %v220_v41 = vmul.f32 %v3478_v37, %v214_v38 }
 0x489   :  { %v221_v43 = vmul.f32 %v3478_v37, %v215_v40  ;;  %v226_v44 = vadd.f32 %v3479_v42, %v220_v41 }
 0x48b   :  { %v227_v45 = vadd.f32 %v3479_v42, %v221_v43 }
 0x48d   :  { %v228_v47 = vpack.c.bf16 %v227_v45, %v226_v44 }
 0x48f   :  { %3749 = vmatmul.mubr.msk.bf16.vlgmr.msra.gmra.mrb[0].mxu1 %vm144_vm2, %v228_v47  ;;  %3769 = vmatmul.mubr.msk.bf16.vlgmr.msra.gmra.mrb[4].mxu0 %vm144_vm2, %v228_v47 }
 0x490   :  { %3753 = vmatpush3.bf16.msra.mxu1 %v4149_v46  ;;  %3758 = vmatprep.mubr.msk.bf16.mxu1 %vm4329_vm1, %v4328_v15 }
 0x491   :  { %3754 = vmatprep.subr.bf16.mxu1 %v4328_v15  ;;  %3790 = vmatprep.mubr.msk.bf16.mxu0 %vm4329_vm1, %v4328_v15 }
 0x494   :  { %3755 = vmatpush3.bf16.msra.mxu1 %v4150_v48 }
 0x495   :  { %3756 = vmatprep.subr.bf16.mxu1 %v4328_v15 }
 0x498   :  { %3757 = vmatpush3.bf16.msra.mxu1 %v4151_v49 }
 0x499   :  { %3772 = vmatprep.subr.bf16.mxu1 %v4328_v15 }
 0x49b   :  { %3759 = vmatmul.mubr.msk.bf16.vlgmr.msra.gmra.mrb[4].mxu1 %vm144_vm2, %v228_v47 }
 0x49c   :  { %3773 = vmatpush3.bf16.msra.mxu1 %v4152_v50  ;;  %3778 = vmatprep.mubr.msk.bf16.mxu1 %vm4329_vm1, %v4328_v15 }
 0x49d   :  { %3774 = vmatprep.subr.bf16.mxu1 %v4328_v15 }
 0x4a0   :  { %3775 = vmatpush3.bf16.msra.mxu1 %v4153_v51 }
 0x4a1   :  { %3776 = vmatprep.subr.bf16.mxu1 %v4328_v15 }
 0x4a4   :  { %3777 = vmatpush3.bf16.msra.mxu1 %v4154_v52 }
 0x4a5   :  { %3782 = vmatprep.subr.bf16.mxu1 %v4328_v15 }
 0x4a7   :  { %3779 = vmatmul.mubr.msk.bf16.vlgmr.msra.gmra.mrb[8].mxu1 %vm144_vm2, %v228_v47 }
 0x4a8   :  { %3784 = vmatprep.mubr.msk.bf16.mxu1 %vm4329_vm1, %v4328_v15 }
 0x562   :  { %v308_v53 = vpop.f32.mrb[0].mxu1  ;;  %v426_v54 = vpop.f32.mrb[4].mxu0 }
 0x563   :  { %v4495_v55 = vpack.c.bf16 %v308_v53, %v308_v53  ;;  %v3750_v56 = vpop.f32.mrb[1].mxu1  ;;  %v3770_v57 = vpop.f32.mrb[5].mxu0  ;;  %v4501_v63 = vpack.c.bf16 %v426_v54, %v426_v54 }
 0x564   :  { %v311_v58 = vpop.f32.mrb[2].mxu1  ;;  %v429_v59 = vpop.f32.mrb[6].mxu0 }
 0x565   :  { %v4497_v60 = vpack.c.bf16 %v311_v58, %v311_v58  ;;  %501 = vrot.lane.b32.xlu0 %v4495_v55, %s4330_s10  ;;  %v3751_v61 = vpop.f32.mrb[3].mxu1  ;;  %v3771_v62 = vpop.f32.mrb[7].mxu0  ;;  %v4515_v6 = vpack.c.bf16 %v429_v59, %v429_v59 }
 0x567   :  { %551 = vrot.lane.b32.xlu1 %v4497_v60, %s4330_s10 }
 0x569   :  { %698 = vrot.lane.b32.xlu0 %v4501_v63, %s4330_s10 }
 0x56e   :  { %v367_v0 = vpop.f32.mrb[4].mxu1 }
 0x56f   :  { %v4507_v1 = vpack.c.bf16 %v367_v0, %v367_v0  ;;  %v3760_v2 = vpop.f32.mrb[5].mxu1 }
 0x570   :  { %v370_v3 = vpop.f32.mrb[6].mxu1 }
 0x571   :  { %600 = vrot.lane.b32.xlu1 %v4507_v1, %s4330_s10  ;;  %v3761_v4 = vpop.f32.mrb[7].mxu1  ;;  %v4511_v5 = vpack.c.bf16 %v370_v3, %v370_v3 }
 0x575   :  { %649 = vrot.lane.b32.xlu1 %v4511_v5, %s4330_s10 }
 0x579   :  { %747 = vrot.lane.b32.xlu1 %v4515_v6, %s4330_s10 }
 0x57a   :  { %v485_v7 = vpop.f32.mrb[8].mxu1 }
 0x57b   :  { %v4519_v9 = vpack.c.bf16 %v485_v7, %v485_v7  ;;  %v3780_v10 = vpop.f32.mrb[9].mxu1 }
 0x57c   :  { %v488_v12 = vpop.f32.mrb[10].mxu1 }
 0x57d   :  { %v4521_v13 = vpack.c.bf16 %v488_v12, %v488_v12  ;;  %v3781_v14 = vpop.f32.mrb[11].mxu1  ;;  %796 = vrot.lane.b32.xlu0 %v4519_v9, %s4330_s10 }
 0x57f   :  { %845 = vrot.lane.b32.xlu1 %v4521_v13, %s4330_s10 }
 0x5d7   :  { %v502_v16 = vpop.permute.xlu0 %501 }
 0x5d8   :  { %v508_v17 = vsel %vm503_vm3, %v502_v16, 0 }
 0x5d9   :  { %3783 = vmatpush3.bf16.xpose.msra.mxu1 %v508_v17  ;;  %v552_v18 = vpop.permute.xlu1 %551 }
 0x5da   :  { %v557_v19 = vsel %vm503_vm3, %v552_v18, 0  ;;  %3794 = vmatprep.subr.bf16.mxu1 %v4328_v15 }
 0x5db   :  { %3789 = vmatpush3.bf16.xpose.msra.mxu0 %v557_v19  ;;  %v699_v24 = vpop.permute.xlu0 %698 }
 0x5dc   :  { %3800 = vmatprep.subr.bf16.mxu0 %v4328_v15  ;;  %v704_v25 = vsel %vm503_vm3, %v699_v24, 0 }
 0x5e0   :  { %3785 = vmatmul.mubr.msk.bf16.vlgmr.msra.gmra.mrb[12].mxu1 %vm503_vm3, %v4495_v55 }
 0x5e1   :  { %3796 = vmatprep.mubr.msk.bf16.mxu1 %vm4329_vm1, %v4328_v15 }
 0x5e2   :  { %3791 = vmatmul.mubr.msk.bf16.vlgmr.msra.gmra.mrb[8].mxu0 %vm503_vm3, %v4497_v60 }
 0x5e3   :  { %v601_v20 = vpop.permute.xlu1 %600  ;;  %3802 = vmatprep.mubr.msk.bf16.mxu0 %vm4329_vm1, %v4328_v15 }
 0x5e4   :  { %v606_v21 = vsel %vm503_vm3, %v601_v20, 0 }
 0x5e5   :  { %3795 = vmatpush3.bf16.xpose.msra.mxu1 %v606_v21 }
 0x5e6   :  { %3806 = vmatprep.subr.bf16.mxu1 %v4328_v15 }
 0x5e7   :  { %v650_v22 = vpop.permute.xlu1 %649 }
 0x5e8   :  { %v655_v23 = vsel %vm503_vm3, %v650_v22, 0 }
 0x5e9   :  { %3801 = vmatpush3.bf16.xpose.msra.mxu0 %v655_v23 }
 0x5ea   :  { %3812 = vmatprep.subr.bf16.mxu0 %v4328_v15 }
 0x5eb   :  { %v748_v26 = vpop.permute.xlu1 %747 }
 0x5ec   :  { %3797 = vmatmul.mubr.msk.bf16.vlgmr.msra.gmra.mrb[16].mxu1 %vm503_vm3, %v4507_v1  ;;  %v753_v27 = vsel %vm503_vm3, %v748_v26, 0 }
 0x5ed   :  { %3807 = vmatpush3.bf16.xpose.msra.mxu1 %v704_v25  ;;  %3808 = vmatprep.mubr.msk.bf16.mxu1 %vm4329_vm1, %v4328_v15 }
 0x5ee   :  { %3818 = vmatprep.subr.bf16.mxu1 %v4328_v15 }
 0x5ef   :  { %v797_v28 = vpop.permute.xlu0 %796 }
 0x5f0   :  { %3803 = vmatmul.mubr.msk.bf16.vlgmr.msra.gmra.mrb[12].mxu0 %vm503_vm3, %v4511_v5  ;;  %v802_v29 = vsel %vm503_vm3, %v797_v28, 0 }
 0x5f1   :  { %3813 = vmatpush3.bf16.xpose.msra.mxu0 %v753_v27  ;;  %3814 = vmatprep.mubr.msk.bf16.mxu0 %vm4329_vm1, %v4328_v15  ;;  %v846_v30 = vpop.permute.xlu1 %845 }
 0x5f2   :  { %3824 = vmatprep.subr.bf16.mxu0 %v4328_v15  ;;  %v851_v31 = vsel %vm503_vm3, %v846_v30, 0 }
 0x5f4   :  { %3809 = vmatmul.mubr.msk.bf16.vlgmr.msra.gmra.mrb[20].mxu1 %vm503_vm3, %v4501_v63 }
 0x5f5   :  { %3819 = vmatpush3.bf16.xpose.msra.mxu1 %v802_v29  ;;  %3820 = vmatprep.mubr.msk.bf16.mxu1 %vm4329_vm1, %v4328_v15 }
 0x5f6   :  { %3830 = vmatprep.subr.bf16.mxu1 %v4328_v15 }
 0x5f8   :  { %3815 = vmatmul.mubr.msk.bf16.vlgmr.msra.gmra.mrb[16].mxu0 %vm503_vm3, %v4515_v6 }
 0x5f9   :  { %3825 = vmatpush3.bf16.xpose.msra.mxu0 %v851_v31  ;;  %3826 = vmatprep.mubr.msk.bf16.mxu0 %vm4329_vm1, %v4328_v15 }
 0x5fa   :  { %3836 = vmatprep.subr.bf16.mxu0 %v4328_v15 }
 0x5fc   :  { %3821 = vmatmul.mubr.msk.bf16.vlgmr.msra.gmra.mrb[24].mxu1 %vm503_vm3, %v4519_v9 }
 0x5fd   :  { %3832 = vmatprep.mubr.msk.bf16.mxu1 %vm4329_vm1, %v4328_v15 }
 0x600   :  { %3827 = vmatmul.mubr.msk.bf16.vlgmr.msra.gmra.mrb[20].mxu0 %vm503_vm3, %v4521_v13 }
 0x601   :  { %3838 = vmatprep.mubr.msk.bf16.mxu0 %vm4329_vm1, %v4328_v15 }
 0x6b3   :  { %v544_v32 = vpop.f32.mrb[12].mxu1 }
 0x6b4   :  { %v3786_v33 = vpop.f32.mrb[13].mxu1  ;;  %v894_v34 = vsel %vm893_vm4, %v544_v32, -inf }
 0x6b5   :  { %v547_v35 = vpop.f32.mrb[14].mxu1  ;;  %895 = vmax.xlane.f32.xlu0 %v894_v34  ;;  %v593_v36 = vpop.f32.mrb[8].mxu0 }
 0x6b6   :  { %v3787_v37 = vpop.f32.mrb[15].mxu1  ;;  %v3792_v38 = vpop.f32.mrb[9].mxu0  ;;  %v897_v39 = vsel %vm893_vm4, %v593_v36, -inf }
 0x6b7   :  { %898 = vmax.xlane.f32.xlu1 %v897_v39  ;;  %v596_v40 = vpop.f32.mrb[10].mxu0 }
 0x6b8   :  { %v3793_v41 = vpop.f32.mrb[11].mxu0 }
 0x6bf   :  { %v642_v42 = vpop.f32.mrb[16].mxu1 }
 0x6c0   :  { %v3798_v43 = vpop.f32.mrb[17].mxu1  ;;  %v900_v44 = vsel %vm893_vm4, %v642_v42, -inf }
 0x6c1   :  { %v645_v45 = vpop.f32.mrb[18].mxu1  ;;  %901 = vmax.xlane.f32.xlu0 %v900_v44 }
 0x6c2   :  { %v3799_v46 = vpop.f32.mrb[19].mxu1 }
 0x6c3   :  { %v4578_v47 = vpop.f32.mrb[12].mxu0 }
 0x6c4   :  { %v3804_v48 = vpop.f32.mrb[13].mxu0  ;;  %v903_v49 = vsel %vm893_vm4, %v4578_v47, -inf }
 0x6c5   :  { %904 = vmax.xlane.f32.xlu0 %v903_v49  ;;  %v694_v50 = vpop.f32.mrb[14].mxu0 }
 0x6c6   :  { %v3805_v51 = vpop.f32.mrb[15].mxu0 }
 0x6c7   :  { %v4582_v52 = vpop.f32.mrb[20].mxu1 }
 0x6c8   :  { %v3810_v53 = vpop.f32.mrb[21].mxu1  ;;  %v906_v54 = vsel %vm893_vm4, %v4582_v52, -inf }
 0x6c9   :  { %v743_v56 = vpop.f32.mrb[22].mxu1  ;;  %907 = vmax.xlane.f32.xlu0 %v906_v54 }
 0x6ca   :  { %v3811_v57 = vpop.f32.mrb[23].mxu1 }
 0x6cb   :  { %v4586_v58 = vpop.f32.mrb[16].mxu0 }
 0x6cc   :  { %v3816_v59 = vpop.f32.mrb[17].mxu0  ;;  %v909_v61 = vsel %vm893_vm4, %v4586_v58, -inf }
 0x6cd   :  { %910 = vmax.xlane.f32.xlu1 %v909_v61  ;;  %v792_v62 = vpop.f32.mrb[18].mxu0 }
 0x6ce   :  { %v3817_v0 = vpop.f32.mrb[19].mxu0 }
 0x6cf   :  { %v4590_v2 = vpop.f32.mrb[24].mxu1 }
 0x6d0   :  { %v3822_v3 = vpop.f32.mrb[25].mxu1  ;;  %v912_v4 = vsel %vm893_vm4, %v4590_v2, -inf }
 0x6d1   :  { %v841_v7 = vpop.f32.mrb[26].mxu1  ;;  %913 = vmax.xlane.f32.xlu0 %v912_v4 }
 0x6d2   :  { %v3823_v10 = vpop.f32.mrb[27].mxu1 }
 0x6d3   :  { %v4594_v12 = vpop.f32.mrb[20].mxu0 }
 0x6d4   :  { %v3828_v14 = vpop.f32.mrb[21].mxu0  ;;  %v915_v18 = vsel %vm893_vm4, %v4594_v12, -inf }
 0x6d5   :  { %v890_v16 = vpop.f32.mrb[22].mxu0 }
 0x6d6   :  { %v3829_v17 = vpop.f32.mrb[23].mxu0 }
 0x6de   :  { %1039 = vrot.lane.b32.xlu1 %v4497_v60, %s4331_s11 }
 0x6e2   :  { %1087 = vrot.lane.b32.xlu1 %v4507_v1, %s4331_s11 }
 0x6e7   :  { %990 = vrot.lane.b32.xlu0 %v4495_v55, %s4331_s11 }
 0x706   :  { %916 = vmax.xlane.f32.xlu1 %v915_v18 }
 0x717   :  { %1135 = vrot.lane.b32.xlu1 %v4511_v5, %s4331_s11 }
 0x742   :  { %v896_v19 = vpop.xlane.xlu0 %895 }
 0x743   :  { %v918_v20 = vsub.f32 %v544_v32, %v896_v19 }
 0x744   :  { %v899_v21 = vpop.xlane.xlu1 %898 }
 0x745   :  { %v926_v22 = vmul.f32 1.442695, %v918_v20  ;;  %v919_v23 = vsub.f32 %v593_v36, %v899_v21 }
 0x747   :  { %4208 = vpow2.f32 %v926_v22  ;;  %v928_v60 = vmul.f32 1.442695, %v919_v23 }
 0x749   :  { %4210 = vpow2.f32 %v928_v60 }
 0x74e   :  { %v902_v24 = vpop.xlane.xlu0 %901 }
 0x74f   :  { %v920_v1 = vsub.f32 %v642_v42, %v902_v24 }
 0x751   :  { %v4606_v25 = vpop.eup %4208  ;;  %v930_v55 = vmul.f32 1.442695, %v920_v1 }
 0x752   :  { %v942_v26 = vsel %vm893_vm4, %v4606_v25, 0.0  ;;  %v905_v5 = vpop.xlane.xlu0 %904 }
 0x753   :  { %v4610_v27 = vpop.eup %4210  ;;  %4212 = vpow2.f32 %v930_v55  ;;  %943 = vadd.xlane.f32.xlu0 %v942_v26  ;;  %v921_v38 = vsub.f32 %v4578_v47, %v905_v5 }
 0x754   :  { %v945_v28 = vsel %vm893_vm4, %v4610_v27, 0.0 }
 0x755   :  { %946 = vadd.xlane.f32.xlu1 %v945_v28  ;;  %v932_v39 = vmul.f32 1.442695, %v921_v38 }
 0x756   :  { %v908_v29 = vpop.xlane.xlu0 %907 }
 0x757   :  { %4214 = vpow2.f32 %v932_v39  ;;  %v922_v42 = vsub.f32 %v4582_v52, %v908_v29 }
 0x759   :  { %v934_v43 = vmul.f32 1.442695, %v922_v42 }
 0x75a   :  { %v911_v30 = vpop.xlane.xlu1 %910 }
 0x75b   :  { %v923_v40 = vsub.f32 %v4586_v58, %v911_v30 }
 0x75d   :  { %v4614_v31 = vpop.eup %4212  ;;  %v936_v41 = vmul.f32 1.442695, %v923_v40 }
 0x75e   :  { %v914_v32 = vpop.xlane.xlu0 %913  ;;  %v1040_v33 = vpop.permute.xlu1 %1039  ;;  %v948_v34 = vsel %vm893_vm4, %v4614_v31, 0.0 }
 0x75f   :  { %v1045_v35 = vsel %vm995_vm5, %v1040_v33, 0  ;;  %949 = vadd.xlane.f32.xlu0 %v948_v34  ;;  %4216 = vpow2.f32 %v936_v41  ;;  %v924_v44 = vsub.f32 %v4590_v2, %v914_v32 }
 0x760   :  { %3837 = vmatpush3.bf16.msra.mxu0 %v1045_v35  ;;  %4218 = vpow2.f32 %v934_v43 }
 0x761   :  { %3848 = vmatprep.subr.bf16.mxu0 %v4328_v15  ;;  %v4630_v45 = vpop.eup %4214 }
 0x762   :  { %v991_v36 = vpop.permute.xlu0 %990  ;;  %v951_v46 = vsel %vm893_vm4, %v4630_v45, 0.0  ;;  %v1088_v48 = vpop.permute.xlu1 %1087 }
 0x763   :  { %v997_v37 = vsel %vm995_vm5, %v991_v36, 0 }
 0x764   :  { %3831 = vmatpush3.bf16.msra.mxu1 %v997_v37 }
 0x765   :  { %3842 = vmatprep.subr.bf16.mxu1 %v4328_v15 }
 0x766   :  { %1231 = vrot.lane.b32.xlu1 %v4515_v6, %s4331_s11  ;;  %v938_v6 = vmul.f32 1.442695, %v924_v44 }
 0x768   :  { %4220 = vpow2.f32 %v938_v6 }
 0x769   :  { %v4634_v47 = vpop.eup %4216 }
 0x76a   :  { %v4638_v49 = vpop.eup %4218 }
 0x76b   :  { %v954_v51 = vsel %vm893_vm4, %v4638_v49, 0.0 }
 0x772   :  { %v4642_v52 = vpop.eup %4220 }
 0x773   :  { %v960_v56 = vsel %vm893_vm4, %v4642_v52, 0.0 }
 0x775   :  { %1183 = vrot.lane.b32.xlu0 %v4501_v63, %s4331_s11  ;;  %v957_v63 = vsel %vm893_vm4, %v4634_v47, 0.0 }
 0x78a   :  { %952 = vadd.xlane.f32.xlu1 %v951_v46 }
 0x78e   :  { %958 = vadd.xlane.f32.xlu1 %v957_v63 }
 0x793   :  { %v917_v50 = vpop.xlane.xlu1 %916 }
 0x794   :  { %v925_v53 = vsub.f32 %v4594_v12, %v917_v50  ;;  %955 = vadd.xlane.f32.xlu0 %v954_v51  ;;  %v1093_v12 = vsel %vm995_vm5, %v1088_v48, 0 }
 0x796   :  { %v940_v54 = vmul.f32 1.442695, %v925_v53 }
 0x797   :  { %v1136_v59 = vpop.permute.xlu1 %1135 }
 0x798   :  { %4222 = vpow2.f32 %v940_v54  ;;  %961 = vadd.xlane.f32.xlu0 %v960_v56 }
 0x7a2   :  { %v4647_v57 = vpop.eup %4222 }
 0x7a3   :  { %v963_v58 = vsel %vm893_vm4, %v4647_v57, 0.0 }
 0x7a4   :  { %964 = vadd.xlane.f32.xlu1 %v963_v58 }
 0x7ae   :  { %1279 = vrot.lane.b32.xlu0 %v4519_v9, %s4331_s11 }
 0x7b5   :  { %1327 = vrot.lane.b32.xlu1 %v4521_v13, %s4331_s11  ;;  %v1141_v13 = vsel %vm995_vm5, %v1136_v59, 0  ;;  %v4156_v59 = vld [vmem:[%s5197_s2 + $0x88] sm:$0xff]  }
 0x7e0   :  { %v944_v61 = vpop.xlane.xlu0 %943 }
 0x7e1   :  { %4224 = vrcp.f32 %v944_v61 }
 0x7e2   :  { %v947_v62 = vpop.xlane.xlu1 %946 }
 0x7e3   :  { %4226 = vrcp.f32 %v947_v62  ;;  %v4157_v62 = vld [vmem:[%s5197_s2 + $0x90] sm:$0xff]  }
 0x7e6   :  { %v1232_v20 = vpop.permute.xlu1 %1231 }
 0x7e7   :  { %v1237_v26 = vsel %vm995_vm5, %v1232_v20, 0 }
 0x7eb   :  { %v4225_v0 = vpop.eup %4224 }
 0x7ec   :  { %v967_v2 = vmul.f32 %v4225_v0, %v4606_v25  ;;  %v950_v3 = vpop.xlane.xlu0 %949 }
 0x7ed   :  { %v4227_v4 = vpop.eup %4226  ;;  %4228 = vrcp.f32 %v950_v3 }
 0x7ee   :  { %v969_v7 = vmul.f32 %v4227_v4, %v4610_v27  ;;  %v982_v10 = vpack.c.bf16 %v967_v2, %v967_v2 }
 0x7f0   :  { %3833 = vmatmul.mubr.msk.bf16.vlgmr.msra.gmra.mrb[28].mxu1 %vm893_vm4, %v982_v10  ;;  %v983_v9 = vpack.c.bf16 %v969_v7, %v969_v7  ;;  %v1184_v17 = vpop.permute.xlu0 %1183 }
 0x7f1   :  { %3843 = vmatpush3.bf16.msra.mxu1 %v1093_v12  ;;  %3844 = vmatprep.mubr.msk.bf16.mxu1 %vm4329_vm1, %v4328_v15  ;;  %v1189_v19 = vsel %vm995_vm5, %v1184_v17, 0 }
 0x7f2   :  { %3839 = vmatmul.mubr.msk.bf16.vlgmr.msra.gmra.mrb[24].mxu0 %vm893_vm4, %v983_v9  ;;  %3854 = vmatprep.subr.bf16.mxu1 %v4328_v15 }
 0x7f3   :  { %3849 = vmatpush3.bf16.msra.mxu0 %v1141_v13  ;;  %3850 = vmatprep.mubr.msk.bf16.mxu0 %vm4329_vm1, %v4328_v15  ;;  %v4158_v13 = vld [vmem:[%s5197_s2 + $0x98] sm:$0xff]  }
 0x7f4   :  { %3860 = vmatprep.subr.bf16.mxu0 %v4328_v15 }
 0x7f7   :  { %v4229_v14 = vpop.eup %4228 }
 0x7f8   :  { %v971_v16 = vmul.f32 %v4229_v14, %v4614_v31 }
 0x7fa   :  { %v984_v18 = vpack.c.bf16 %v971_v16, %v971_v16 }
 0x7fc   :  { %3845 = vmatmul.mubr.msk.bf16.vlgmr.msra.gmra.mrb[32].mxu1 %vm893_vm4, %v984_v18 }
 0x7fd   :  { %3855 = vmatpush3.bf16.msra.mxu1 %v1189_v19  ;;  %3856 = vmatprep.mubr.msk.bf16.mxu1 %vm4329_vm1, %v4328_v15 }
 0x7fe   :  { %3866 = vmatprep.subr.bf16.mxu1 %v4328_v15 }
 0x817   :  { %v953_v21 = vpop.xlane.xlu1 %952 }
 0x818   :  { %4230 = vrcp.f32 %v953_v21 }
 0x81b   :  { %v959_v22 = vpop.xlane.xlu1 %958 }
 0x81c   :  { %4232 = vrcp.f32 %v959_v22 }
 0x821   :  { %v956_v23 = vpop.xlane.xlu0 %955 }
 0x822   :  { %v4231_v60 = vpop.eup %4230  ;;  %4234 = vrcp.f32 %v956_v23 }
 0x823   :  { %v973_v24 = vmul.f32 %v4231_v60, %v4630_v45 }
 0x825   :  { %v962_v1 = vpop.xlane.xlu0 %961  ;;  %v985_v25 = vpack.c.bf16 %v973_v24, %v973_v24 }
 0x826   :  { %v4233_v55 = vpop.eup %4232  ;;  %4236 = vrcp.f32 %v962_v1 }
 0x827   :  { %3851 = vmatmul.mubr.msk.bf16.vlgmr.msra.gmra.mrb[28].mxu0 %vm893_vm4, %v985_v25  ;;  %v977_v27 = vmul.f32 %v4233_v55, %v4634_v47 }
 0x828   :  { %3861 = vmatpush3.bf16.msra.mxu0 %v1237_v26  ;;  %3862 = vmatprep.mubr.msk.bf16.mxu0 %vm4329_vm1, %v4328_v15 }
 0x829   :  { %3872 = vmatprep.subr.bf16.mxu0 %v4328_v15  ;;  %v987_v29 = vpack.c.bf16 %v977_v27, %v977_v27  ;;  %v1280_v30 = vpop.permute.xlu0 %1279 }
 0x82a   :  { %v1285_v33 = vsel %vm995_vm5, %v1280_v30, 0 }
 0x82c   :  { %v4235_v5 = vpop.eup %4234 }
 0x82d   :  { %v975_v28 = vmul.f32 %v4235_v5, %v4638_v49 }
 0x82f   :  { %3863 = vmatmul.mubr.msk.bf16.vlgmr.msra.gmra.mrb[32].mxu0 %vm893_vm4, %v987_v29  ;;  %v986_v31 = vpack.c.bf16 %v975_v28, %v975_v28 }
 0x830   :  { %v4237_v32 = vpop.eup %4236  ;;  %3874 = vmatprep.mubr.msk.bf16.mxu0 %vm4329_vm1, %v4328_v15 }
 0x831   :  { %3857 = vmatmul.mubr.msk.bf16.vlgmr.msra.gmra.mrb[36].mxu1 %vm893_vm4, %v986_v31  ;;  %v965_v34 = vpop.xlane.xlu1 %964  ;;  %v979_v35 = vmul.f32 %v4237_v32, %v4642_v52 }
 0x832   :  { %3867 = vmatpush3.bf16.msra.mxu1 %v1285_v33  ;;  %4238 = vrcp.f32 %v965_v34  ;;  %3868 = vmatprep.mubr.msk.bf16.mxu1 %vm4329_vm1, %v4328_v15 }
 0x833   :  { %3878 = vmatprep.subr.bf16.mxu1 %v4328_v15  ;;  %v988_v38 = vpack.c.bf16 %v979_v35, %v979_v35 }
 0x835   :  { %v1328_v36 = vpop.permute.xlu1 %1327 }
 0x836   :  { %v1333_v37 = vsel %vm995_vm5, %v1328_v36, 0 }
 0x837   :  { %3873 = vmatpush3.bf16.msra.mxu0 %v1333_v37 }
 0x838   :  { %3890 = vmatprep.subr.bf16.mxu0 %v4328_v15 }
 0x839   :  { %3869 = vmatmul.mubr.msk.bf16.vlgmr.msra.gmra.mrb[40].mxu1 %vm893_vm4, %v988_v38 }
 0x83a   :  { %3886 = vmatprep.mubr.msk.bf16.mxu1 %vm4329_vm1, %v4328_v15 }
 0x83c   :  { %v4239_v39 = vpop.eup %4238 }
 0x83d   :  { %v981_v40 = vmul.f32 %v4239_v39, %v4647_v57  ;;  %v4155_v57 = vld [vmem:[%s5197_s2 + $0x80] sm:$0xff]  }
 0x83e   :  { %3879 = vmatpush3.bf16.msra.mxu1 %v4155_v57 }
 0x83f   :  { %v989_v41 = vpack.c.bf16 %v981_v40, %v981_v40  ;;  %3880 = vmatprep.subr.bf16.mxu1 %v4328_v15 }
 0x841   :  { %3875 = vmatmul.mubr.msk.bf16.vlgmr.msra.gmra.mrb[36].mxu0 %vm893_vm4, %v989_v41 }
 0x842   :  { %3896 = vmatprep.mubr.msk.bf16.mxu0 %vm4329_vm1, %v4328_v15  ;;  %3881 = vmatpush3.bf16.msra.mxu1 %v4156_v59 }
 0x843   :  { %3882 = vmatprep.subr.bf16.mxu1 %v4328_v15 }
 0x846   :  { %3883 = vmatpush3.bf16.msra.mxu1 %v4157_v62 }
 0x847   :  { %3884 = vmatprep.subr.bf16.mxu1 %v4328_v15 }
 0x84a   :  { %3885 = vmatpush3.bf16.msra.mxu1 %v4158_v13 }
 0x84b   :  { %3900 = vmatprep.subr.bf16.mxu1 %v4328_v15 }
 0x8c3   :  { %v4699_v42 = vpop.f32.mrb[28].mxu1 }
 0x8c4   :  { %v3834_v43 = vpop.f32.mrb[29].mxu1 }
 0x8c5   :  { %v1036_v44 = vpop.f32.mrb[30].mxu1  ;;  %v1081_v45 = vpop.f32.mrb[24].mxu0 }
 0x8c6   :  { %v3835_v6 = vpop.f32.mrb[31].mxu1  ;;  %v3840_v46 = vpop.f32.mrb[25].mxu0 }
 0x8c7   :  { %v1084_v47 = vpop.f32.mrb[26].mxu0 }
 0x8c8   :  { %v3841_v63 = vpop.f32.mrb[27].mxu0 }
 0x8cf   :  { %v1129_v48 = vpop.f32.mrb[32].mxu1 }
 0x8d0   :  { %v3846_v49 = vpop.f32.mrb[33].mxu1 }
 0x8d1   :  { %v1132_v50 = vpop.f32.mrb[34].mxu1 }
 0x8d2   :  { %v3847_v51 = vpop.f32.mrb[35].mxu1  ;;  %v4159_v50 = vld [vmem:[%s5197_s2 + $0xa0] sm:$0xff]  }
 0x8d3   :  { %3891 = vmatpush3.bf16.msra.mxu0 %v4159_v50  ;;  %v4160_v51 = vld [vmem:[%s5197_s2 + $0xa8] sm:$0xff]  }
 0x8d4   :  { %3892 = vmatprep.subr.bf16.mxu0 %v4328_v15 }
 0x8d7   :  { %3893 = vmatpush3.bf16.msra.mxu0 %v4160_v51 }
 0x8d8   :  { %3894 = vmatprep.subr.bf16.mxu0 %v4328_v15 }
 0x8fa   :  { %v1177_v52 = vpop.f32.mrb[28].mxu0 }
 0x8fb   :  { %v4109_v53 = vpack.i.bf16 %v1177_v52, %v1129_v48  ;;  %v3852_v54 = vpop.f32.mrb[29].mxu0  ;;  %v4161_v52 = vld [vmem:[%s5197_s2 + $0xb0] sm:$0xff]  }
 0x8fc   :  { %v1180_v56 = vpop.f32.mrb[30].mxu0  ;;  %3895 = vmatpush3.bf16.msra.mxu0 %v4161_v52 }
 0x8fd   :  { %4110 = vrot.lane.b32.xlu0 %v4109_v53, %s4332_s14  ;;  %v3853_v58 = vpop.f32.mrb[31].mxu0  ;;  %3916 = vmatprep.subr.bf16.mxu0 %v4328_v15 }
 0x902   :  { %v1273_v61 = vpop.f32.mrb[32].mxu0 }
 0x903   :  { %v3864_v0 = vpop.f32.mrb[33].mxu0 }
 0x904   :  { %v1225_v2 = vpop.f32.mrb[36].mxu1  ;;  %v1276_v3 = vpop.f32.mrb[34].mxu0  ;;  %v3517_v0 = vld [vmem:[%s5196_s1 + $0x17] ss:$0 sm:$0xff] }
 0x905   :  { %v4114_v4 = vpack.i.bf16 %v1273_v61, %v1225_v2  ;;  %v3858_v7 = vpop.f32.mrb[37].mxu1  ;;  %v3865_v10 = vpop.f32.mrb[35].mxu0 }
 0x906   :  { %v1228_v12 = vpop.f32.mrb[38].mxu1  ;;  %v3518_v7 = vld [vmem:[%s5196_s1 + $0x18] ss:$0 sm:$0xff] }
 0x907   :  { %v3859_v9 = vpop.f32.mrb[39].mxu1  ;;  %4115 = vrot.lane.b32.xlu1 %v4114_v4, %s4333_s18 }
 0x90c   :  { %v1321_v14 = vpop.f32.mrb[40].mxu1 }
 0x90d   :  { %v3870_v16 = vpop.f32.mrb[41].mxu1 }
 0x90e   :  { %v1324_v17 = vpop.f32.mrb[42].mxu1  ;;  %v4163_v16 = vld [vmem:[%s5197_s2 + $0xc0] sm:$0xff]  }
 0x90f   :  { %v3871_v18 = vpop.f32.mrb[43].mxu1  ;;  %v4164_v17 = vld [vmem:[%s5197_s2 + $0xc8] sm:$0xff]  }
 0x910   :  { %v4165_v18 = vld [vmem:[%s5197_s2 + $0xd0] sm:$0xff]  }
 0x914   :  { %v1369_v19 = vpop.f32.mrb[36].mxu0 }
 0x915   :  { %v4119_v20 = vpack.i.bf16 %v1369_v19, %v1321_v14  ;;  %v3876_v21 = vpop.f32.mrb[37].mxu0  ;;  %v4162_v14 = vld [vmem:[%s5197_s2 + $0xb8] sm:$0xff]  }
 0x916   :  { %v1372_v22 = vpop.f32.mrb[38].mxu0  ;;  %v4166_v19 = vld [vmem:[%s5197_s2 + $0xd8] sm:$0xff]  }
 0x917   :  { %4120 = vrot.lane.b32.xlu0 %v4119_v20, %s4334_s21  ;;  %v3877_v23 = vpop.f32.mrb[39].mxu0  ;;  %v4167_v20 = vld [vmem:[%s5197_s2 + $0xe0] sm:$0xff]   ;;  %v3519_v21 = vld [vmem:[%s5196_s1 + $0x19] ss:$0 sm:$0xff] }
 0x96f   :  { %v4111_v60 = vpop.permute.xlu0 %4110 }
 0x970   :  { %v4113_v1 = vunpack.i.h.bf16 %v4111_v60  ;;  %v4112_v25 = vunpack.i.l.bf16 %v4111_v60 }
 0x972   :  { %v1400_v5 = vsel %vm503_vm3, %v1081_v45, %v4113_v1  ;;  %v1399_v28 = vsel %vm503_vm3, %v4699_v42, %v4112_v25 }
 0x979   :  { %v4116_v24 = vpop.permute.xlu1 %4115 }
 0x97a   :  { %v4118_v55 = vunpack.i.h.bf16 %v4116_v24  ;;  %v4117_v26 = vunpack.i.l.bf16 %v4116_v24 }
 0x97c   :  { %v1403_v31 = vsel %vm1401_vm6, %v1400_v5, %v4118_v55  ;;  %v1402_v32 = vsel %vm1401_vm6, %v1399_v28, %v4117_v26 }
 0x989   :  { %v4121_v27 = vpop.permute.xlu0 %4120 }
 0x98a   :  { %v4123_v29 = vunpack.i.h.bf16 %v4121_v27  ;;  %v4122_v30 = vunpack.i.l.bf16 %v4121_v27 }
 0x98c   :  { %v1405_v33 = vsel %vm144_vm2, %v1403_v31, %v4123_v29  ;;  %v1404_v34 = vsel %vm144_vm2, %v1402_v32, %v4122_v30 }
 0x98d   :  { %v1414_v35 = vpack.c.bf16 %v1405_v33, %v1404_v34 }
 0x98f   :  { %3887 = vmatmul.mubr.msk.bf16.vlgmr.msra.gmra.mrb[44].mxu1 %vm20_vm0, %v1414_v35 }
 0x990   :  { %3912 = vmatprep.mubr.msk.bf16.mxu1 %vm4329_vm1, %v4328_v15  ;;  %3901 = vmatpush3.bf16.msra.mxu1 %v4162_v14 }
 0x991   :  { %3902 = vmatprep.subr.bf16.mxu1 %v4328_v15 }
 0x994   :  { %3903 = vmatpush3.bf16.msra.mxu1 %v4163_v16 }
 0x995   :  { %3904 = vmatprep.subr.bf16.mxu1 %v4328_v15 }
 0x998   :  { %3905 = vmatpush3.bf16.msra.mxu1 %v4164_v17 }
 0x999   :  { %3906 = vmatprep.subr.bf16.mxu1 %v4328_v15 }
 0x99c   :  { %3907 = vmatpush3.bf16.msra.mxu1 %v4165_v18 }
 0x99d   :  { %3908 = vmatprep.subr.bf16.mxu1 %v4328_v15 }
 0x9a0   :  { %3909 = vmatpush3.bf16.msra.mxu1 %v4166_v19 }
 0x9a1   :  { %3910 = vmatprep.subr.bf16.mxu1 %v4328_v15 }
 0x9a4   :  { %3911 = vmatpush3.bf16.msra.mxu1 %v4167_v20  ;;  %v3531_v20 = vld [vmem:[%s5196_s1 + $0x1a] ss:$0 sm:$0xff] }
 0x9a5   :  { %3936 = vmatprep.subr.bf16.mxu1 %v4328_v15 }
 0xa62   :  { %v1476_v36 = vpop.f32.mrb[44].mxu1 }
 0xa63   :  { %v4731_v37 = vadd.f32 %v1476_v36, %v4417_v8  ;;  %v3888_v38 = vpop.f32.mrb[45].mxu1 }
 0xa64   :  { %v1479_v39 = vpop.f32.mrb[46].mxu1 }
 0xa65   :  { %v4734_v40 = vadd.f32 %v1479_v39, %v4421_v11  ;;  %v3889_v41 = vpop.f32.mrb[47].mxu1  ;;  %v1487_v42 = vsel %vm144_vm2, %v4731_v37, 0.0 }
 0xa66   :  { %1488 = vadd.xlane.f32.xlu1 %v1487_v42 }
 0xa67   :  { %v1490_v43 = vsel %vm144_vm2, %v4734_v40, 0.0 }
 0xa68   :  { %1491 = vadd.xlane.f32.xlu0 %v1490_v43 }
 0xaf3   :  { %v1489_v44 = vpop.xlane.xlu1 %1488 }
 0xaf4   :  { %v1493_v45 = vmul.f32 0.020833334, %v1489_v44 }
 0xaf5   :  { %v1492_v6 = vpop.xlane.xlu0 %1491 }
 0xaf6   :  { %v1495_v8 = vsub.f32 %v4731_v37, %v1493_v45  ;;  %v1494_v46 = vmul.f32 0.020833334, %v1492_v6 }
 0xaf8   :  { %v1496_v47 = vsub.f32 %v4734_v40, %v1494_v46  ;;  %v1497_v63 = vmul.f32 %v1495_v8, %v1495_v8 }
 0xafa   :  { %v1499_v11 = vsel %vm144_vm2, %v1497_v63, 0.0  ;;  %v1498_v48 = vmul.f32 %v1496_v47, %v1496_v47 }
 0xafb   :  { %1500 = vadd.xlane.f32.xlu0 %v1499_v11 }
 0xafc   :  { %v1502_v49 = vsel %vm144_vm2, %v1498_v48, 0.0 }
 0xaff   :  { %1503 = vadd.xlane.f32.xlu0 %v1502_v49 }
 0xb88   :  { %v1501_v53 = vpop.xlane.xlu0 %1500 }
 0xb89   :  { %v1505_v54 = vmul.f32 0.020833334, %v1501_v53 }
 0xb8b   :  { %v1507_v56 = vadd.f32 1e-05, %v1505_v54 }
 0xb8c   :  { %v1504_v57 = vpop.xlane.xlu0 %1503 }
 0xb8d   :  { %4240 = vrsqrt.f32 %v1507_v56  ;;  %v1506_v58 = vmul.f32 0.020833334, %v1504_v57 }
 0xb8f   :  { %v1508_v59 = vadd.f32 1e-05, %v1506_v58 }
 0xb91   :  { %4242 = vrsqrt.f32 %v1508_v59 }
 0xb97   :  { %v4241_v61 = vpop.eup %4240 }
 0xb98   :  { %v1511_v62 = vmul.f32 %v4241_v61, %v1495_v8 }
 0xb9a   :  { %v1517_v3 = vmul.f32 %v3517_v0, %v1511_v62  ;;  %v4335_v62 = vmov -1.0  }
 0xb9b   :  { %v4243_v2 = vpop.eup %4242 }
 0xb9c   :  { %v1512_v4 = vmul.f32 %v4243_v2, %v1496_v47  ;;  %v1523_v12 = vadd.f32 %v3518_v7, %v1517_v3 }
 0xb9e   :  { %v1518_v10 = vmul.f32 %v3517_v0, %v1512_v4 }
 0xba0   :  { %v1524_v9 = vadd.f32 %v3518_v7, %v1518_v10 }
 0xba2   :  { %v1531_v13 = vpack.c.bf16 %v1524_v9, %v1523_v12 }
 0xba4   :  { %3897 = vmatmul.mubr.msk.bf16.vlgmr.msra.gmra.mrb[40].mxu0 %vm144_vm2, %v1531_v13 }
 0xba5   :  { %3922 = vmatprep.mubr.msk.bf16.mxu0 %vm4329_vm1, %v4328_v15 }
 0xc77   :  { %v1592_v22 = vpop.f32.mrb[40].mxu0 }
 0xc78   :  { %v1593_v23 = vadd.f32 %v3519_v21, %v1592_v22  ;;  %v3898_v60 = vpop.f32.mrb[41].mxu0 }
 0xc79   :  { %v1595_v24 = vpop.f32.mrb[42].mxu0 }
 0xc7a   :  { %v1601_v1 = vmul.f32 0.70710677, %v1593_v23  ;;  %v1596_v25 = vadd.f32 %v3519_v21, %v1595_v24  ;;  %v3899_v55 = vpop.f32.mrb[43].mxu0  ;;  %v1599_v9 = vmul.f32 0.5, %v1593_v23 }
 0xc7c   :  { %v1607_v26 = vand.u32 2147483647, %v1601_v1  ;;  %v1602_v27 = vmul.f32 0.70710677, %v1596_v25  ;;  %vm1603_vm7 = vcmp.ge.f32.partialorder %v1601_v1, 0.0  ;;  %v1600_v13 = vmul.f32 0.5, %v1596_v25 }
 0xc7d   :  { %v1605_v0 = vsel %vm1603_vm7, 1.0, %v4335_v62 }
 0xc7e   :  { %v1609_v5 = vmul.f32 0.3275911, %v1607_v26  ;;  %v1608_v28 = vand.u32 2147483647, %v1602_v27  ;;  %v1633_v32 = vsub.f32 0.0, %v1607_v26  ;;  %vm1604_vm8 = vcmp.ge.f32.partialorder %v1602_v27, 0.0 }
 0xc7f   :  { %v1606_v7 = vsel %vm1604_vm8, 1.0, %v4335_v62 }
 0xc80   :  { %v1611_v29 = vadd.f32 1.0, %v1609_v5  ;;  %v1610_v30 = vmul.f32 0.3275911, %v1608_v28  ;;  %v1634_v33 = vsub.f32 0.0, %v1608_v28  ;;  %v1635_v35 = vmul.f32 %v1633_v32, %v1607_v26 }
 0xc82   :  { %4244 = vrcp.f32 %v1611_v29  ;;  %v1612_v31 = vadd.f32 1.0, %v1610_v30  ;;  %v1636_v41 = vmul.f32 %v1634_v33, %v1608_v28  ;;  %v1637_v42 = vmul.f32 1.442695, %v1635_v35  ;;  %v4169_v35 = vld [vmem:[%s5197_s2 + $0x118] sm:$0xff]  }
 0xc84   :  { %4246 = vrcp.f32 %v1612_v31  ;;  %v1639_v8 = vmul.f32 1.442695, %v1636_v41  ;;  %v4173_v41 = vld [vmem:[%s5197_s2 + $0x128] sm:$0xff]  }
 0xc85   :  { %4248 = vpow2.f32 %v1637_v42 }
 0xc86   :  { %4250 = vpow2.f32 %v1639_v8 }
 0xc8c   :  { %v4245_v34 = vpop.eup %4244 }
 0xc8d   :  { %v1615_v36 = vmul.f32 1.0614054, %v4245_v34 }
 0xc8e   :  { %v4247_v38 = vpop.eup %4246 }
 0xc8f   :  { %v1617_v39 = vadd.f32 -1.4531521, %v1615_v36  ;;  %v1616_v43 = vmul.f32 1.0614054, %v4247_v38  ;;  %v4249_v54 = vpop.eup %4248  ;;  %v4170_v36 = vld [vmem:[%s5197_s2 + $0xf0] sm:$0xff]  }
 0xc90   :  { %v4251_v59 = vpop.eup %4250 }
 0xc91   :  { %v1619_v44 = vmul.f32 %v4245_v34, %v1617_v39  ;;  %v1618_v45 = vadd.f32 -1.4531521, %v1616_v43  ;;  %v4172_v39 = vld [vmem:[%s5197_s2 + $0xf8] sm:$0xff]  }
 0xc93   :  { %v1621_v6 = vadd.f32 1.4214138, %v1619_v44  ;;  %v1620_v46 = vmul.f32 %v4247_v38, %v1618_v45 }
 0xc95   :  { %v1623_v47 = vmul.f32 %v4245_v34, %v1621_v6  ;;  %v1622_v63 = vadd.f32 1.4214138, %v1620_v46 }
 0xc97   :  { %v1625_v11 = vadd.f32 -0.28449672, %v1623_v47  ;;  %v1624_v48 = vmul.f32 %v4247_v38, %v1622_v63  ;;  %v3532_v47 = vld [vmem:[%s5196_s1 + $0x1b] ss:$0 sm:$0xff] }
 0xc99   :  { %v1627_v49 = vmul.f32 %v4245_v34, %v1625_v11  ;;  %v1626_v50 = vadd.f32 -0.28449672, %v1624_v48 }
 0xc9b   :  { %v1629_v51 = vadd.f32 0.2548296, %v1627_v49  ;;  %v1628_v52 = vmul.f32 %v4247_v38, %v1626_v50  ;;  %v3533_v50 = vld [vmem:[%s5196_s1 + $0x1c] ss:$0 sm:$0xff] }
 0xc9d   :  { %v1631_v53 = vmul.f32 %v4245_v34, %v1629_v51  ;;  %v1630_v56 = vadd.f32 0.2548296, %v1628_v52  ;;  %v4168_v34 = vld [vmem:[%s5197_s2 + $0xe8] sm:$0xff]  }
 0xc9e   :  { %3917 = vmatpush3.bf16.msra.mxu0 %v4168_v34 }
 0xc9f   :  { %v1641_v57 = vmul.f32 %v4249_v54, %v1631_v53  ;;  %v1632_v58 = vmul.f32 %v4247_v38, %v1630_v56  ;;  %3918 = vmatprep.subr.bf16.mxu0 %v4328_v15  ;;  %v4171_v38 = vld [vmem:[%s5197_s2 + $0x120] sm:$0xff]  }
 0xca0   :  { %v4174_v54 = vld [vmem:[%s5197_s2 + $0x100] sm:$0xff]  }
 0xca1   :  { %v1643_v61 = vsub.f32 1.0, %v1641_v57  ;;  %v1642_v2 = vmul.f32 %v4251_v59, %v1632_v58  ;;  %v4175_v57 = vld [vmem:[%s5197_s2 + $0x108] sm:$0xff]   ;;  %v4176_v58 = vld [vmem:[%s5197_s2 + $0x110] sm:$0xff]  }
 0xca2   :  { %3919 = vmatpush3.bf16.msra.mxu0 %v4170_v36  ;;  %v4177_v59 = vld [vmem:[%s5197_s2 + $0x130] sm:$0xff]  }
 0xca3   :  { %v1645_v3 = vmul.f32 %v1643_v61, %v1605_v0  ;;  %v1644_v4 = vsub.f32 1.0, %v1642_v2  ;;  %3920 = vmatprep.subr.bf16.mxu0 %v4328_v15  ;;  %v4178_v61 = vld [vmem:[%s5197_s2 + $0x138] sm:$0xff]   ;;  %v4179_v0 = vld [vmem:[%s5197_s2 + $0x140] sm:$0xff]  }
 0xca5   :  { %v1647_v10 = vadd.f32 1.0, %v1645_v3  ;;  %v1646_v12 = vmul.f32 %v1644_v4, %v1606_v7 }
 0xca6   :  { %3921 = vmatpush3.bf16.msra.mxu0 %v4172_v39 }
 0xca7   :  { %v1648_v14 = vadd.f32 1.0, %v1646_v12  ;;  %v1649_v16 = vmul.f32 %v1647_v10, %v1599_v9  ;;  %3926 = vmatprep.subr.bf16.mxu0 %v4328_v15 }
 0xca9   :  { %v1650_v17 = vmul.f32 %v1648_v14, %v1600_v13 }
 0xcab   :  { %v1663_v18 = vpack.c.bf16 %v1650_v17, %v1649_v16 }
 0xcad   :  { %3913 = vmatmul.mubr.msk.bf16.vlgmr.msra.gmra.mrb[48].mxu1 %vm1700_vm9, %v1663_v18 }
 0xcae   :  { %3942 = vmatprep.mubr.msk.bf16.mxu1 %vm4329_vm1, %v4328_v15  ;;  %3937 = vmatpush3.bf16.msra.mxu1 %v4169_v35 }
 0xcaf   :  { %3938 = vmatprep.subr.bf16.mxu1 %v4328_v15 }
 0xcb2   :  { %3939 = vmatpush3.bf16.msra.mxu1 %v4171_v38 }
 0xcb3   :  { %3940 = vmatprep.subr.bf16.mxu1 %v4328_v15 }
 0xcb6   :  { %3941 = vmatpush3.bf16.msra.mxu1 %v4173_v41 }
 0xcb7   :  { %3956 = vmatprep.subr.bf16.mxu1 %v4328_v15 }
 0xd80   :  { %v1738_v19 = vpop.f32.mrb[48].mxu1 }
 0xd81   :  { %v1745_v21 = vadd.f32 %v1738_v19, %v4731_v37  ;;  %v3914_v22 = vpop.f32.mrb[49].mxu1 }
 0xd82   :  { %v1741_v23 = vpop.f32.mrb[50].mxu1 }
 0xd83   :  { %v4801_v60 = vadd.f32 %v3531_v20, %v1745_v21  ;;  %v1746_v24 = vadd.f32 %v1741_v23, %v4734_v40  ;;  %v3915_v1 = vpop.f32.mrb[51].mxu1 }
 0xd85   :  { %v4804_v25 = vadd.f32 %v3531_v20, %v1746_v24  ;;  %v1756_v55 = vsel %vm144_vm2, %v4801_v60, 0.0 }
 0xd86   :  { %1757 = vadd.xlane.f32.xlu1 %v1756_v55 }
 0xd87   :  { %v1759_v26 = vsel %vm144_vm2, %v4804_v25, 0.0 }
 0xd88   :  { %1760 = vadd.xlane.f32.xlu0 %v1759_v26 }
 0xe13   :  { %v1758_v27 = vpop.xlane.xlu1 %1757 }
 0xe14   :  { %v1762_v5 = vmul.f32 0.020833334, %v1758_v27 }
 0xe15   :  { %v1761_v37 = vpop.xlane.xlu0 %1760 }
 0xe16   :  { %v1764_v28 = vsub.f32 %v4801_v60, %v1762_v5  ;;  %v1763_v29 = vmul.f32 0.020833334, %v1761_v37 }
 0xe18   :  { %v1765_v30 = vsub.f32 %v4804_v25, %v1763_v29  ;;  %v1766_v40 = vmul.f32 %v1764_v28, %v1764_v28 }
 0xe1a   :  { %v1768_v31 = vsel %vm144_vm2, %v1766_v40, 0.0  ;;  %v1767_v32 = vmul.f32 %v1765_v30, %v1765_v30 }
 0xe1b   :  { %1769 = vadd.xlane.f32.xlu1 %v1768_v31 }
 0xe1c   :  { %v1771_v33 = vsel %vm144_vm2, %v1767_v32, 0.0 }
 0xe1d   :  { %1772 = vadd.xlane.f32.xlu0 %v1771_v33 }
 0xea8   :  { %v1770_v42 = vpop.xlane.xlu1 %1769 }
 0xea9   :  { %v1774_v43 = vmul.f32 0.020833334, %v1770_v42 }
 0xeaa   :  { %v1773_v44 = vpop.xlane.xlu0 %1772 }
 0xeab   :  { %v1776_v45 = vadd.f32 1e-05, %v1774_v43  ;;  %v1775_v6 = vmul.f32 0.020833334, %v1773_v44 }
 0xead   :  { %4252 = vrsqrt.f32 %v1776_v45  ;;  %v1777_v8 = vadd.f32 1e-05, %v1775_v6 }
 0xeaf   :  { %4254 = vrsqrt.f32 %v1777_v8 }
 0xeb7   :  { %v4253_v46 = vpop.eup %4252 }
 0xeb8   :  { %v1780_v63 = vmul.f32 %v4253_v46, %v1764_v28 }
 0xeb9   :  { %v4255_v11 = vpop.eup %4254 }
 0xeba   :  { %v1786_v48 = vmul.f32 %v3532_v47, %v1780_v63  ;;  %v1781_v49 = vmul.f32 %v4255_v11, %v1765_v30 }
 0xebc   :  { %v1787_v51 = vmul.f32 %v3532_v47, %v1781_v49  ;;  %v1792_v52 = vadd.f32 %v3533_v50, %v1786_v48 }
 0xebe   :  { %v1793_v53 = vadd.f32 %v3533_v50, %v1787_v51 }
 0xec0   :  { %v1794_v56 = vpack.c.bf16 %v1793_v53, %v1792_v52 }
 0xec2   :  { %3923 = vmatmul.mubr.msk.bf16.vlgmr.msra.gmra.mrb[44].mxu0 %vm144_vm2, %v1794_v56  ;;  %3943 = vmatmul.mubr.msk.bf16.vlgmr.msra.gmra.mrb[52].mxu1 %vm144_vm2, %v1794_v56 }
 0xec3   :  { %3927 = vmatpush3.bf16.msra.mxu0 %v4174_v54  ;;  %3932 = vmatprep.mubr.msk.bf16.mxu0 %vm4329_vm1, %v4328_v15 }
 0xec4   :  { %3928 = vmatprep.subr.bf16.mxu0 %v4328_v15  ;;  %3958 = vmatprep.mubr.msk.bf16.mxu1 %vm4329_vm1, %v4328_v15 }
 0xec7   :  { %3929 = vmatpush3.bf16.msra.mxu0 %v4175_v57 }
 0xec8   :  { %3930 = vmatprep.subr.bf16.mxu0 %v4328_v15 }
 0xecb   :  { %3931 = vmatpush3.bf16.msra.mxu0 %v4176_v58 }
 0xecc   :  { %3946 = vmatprep.subr.bf16.mxu0 %v4328_v15 }
 0xece   :  { %3933 = vmatmul.mubr.msk.bf16.vlgmr.msra.gmra.mrb[48].mxu0 %vm144_vm2, %v1794_v56 }
 0xecf   :  { %3947 = vmatpush3.bf16.msra.mxu0 %v4177_v59  ;;  %3952 = vmatprep.mubr.msk.bf16.mxu0 %vm4329_vm1, %v4328_v15 }
 0xed0   :  { %3948 = vmatprep.subr.bf16.mxu0 %v4328_v15 }
 0xed3   :  { %3949 = vmatpush3.bf16.msra.mxu0 %v4178_v61 }
 0xed4   :  { %3950 = vmatprep.subr.bf16.mxu0 %v4328_v15 }
 0xed7   :  { %3951 = vmatpush3.bf16.msra.mxu0 %v4179_v0 }
 0xed8   :  { %3962 = vmatprep.subr.bf16.mxu0 %v4328_v15 }
 0xeda   :  { %3953 = vmatmul.mubr.msk.bf16.vlgmr.msra.gmra.mrb[52].mxu0 %vm144_vm2, %v1794_v56 }
 0xedb   :  { %3964 = vmatprep.mubr.msk.bf16.mxu0 %vm4329_vm1, %v4328_v15 }
 0xf95   :  { %v1874_v2 = vpop.f32.mrb[44].mxu0  ;;  %v1992_v3 = vpop.f32.mrb[52].mxu1 }
 0xf96   :  { %v2058_v4 = vpack.c.bf16 %v1874_v2, %v1874_v2  ;;  %v3924_v7 = vpop.f32.mrb[45].mxu0  ;;  %v3944_v10 = vpop.f32.mrb[53].mxu1  ;;  %v4897_v24 = vpack.c.bf16 %v1992_v3, %v1992_v3 }
 0xf97   :  { %v1877_v12 = vpop.f32.mrb[46].mxu0  ;;  %v1995_v9 = vpop.f32.mrb[54].mxu1 }
 0xf98   :  { %v4880_v13 = vpack.c.bf16 %v1877_v12, %v1877_v12  ;;  %v3945_v14 = vpop.f32.mrb[55].mxu1  ;;  %2067 = vrot.lane.b32.xlu1 %v2058_v4, %s4330_s10  ;;  %v3925_v16 = vpop.f32.mrb[47].mxu0  ;;  %v4885_v17 = vpack.c.bf16 %v1995_v9, %v1995_v9 }
 0xf9a   :  { %2116 = vrot.lane.b32.xlu0 %v4880_v13, %s4330_s10 }
 0xf9e   :  { %2312 = vrot.lane.b32.xlu0 %v4885_v17, %s4330_s10 }
 0xfa1   :  { %v1933_v18 = vpop.f32.mrb[48].mxu0 }
 0xfa2   :  { %v4889_v19 = vpack.c.bf16 %v1933_v18, %v1933_v18  ;;  %v3934_v20 = vpop.f32.mrb[49].mxu0 }
 0xfa3   :  { %v1936_v21 = vpop.f32.mrb[50].mxu0 }
 0xfa4   :  { %2165 = vrot.lane.b32.xlu1 %v4889_v19, %s4330_s10  ;;  %v3935_v22 = vpop.f32.mrb[51].mxu0  ;;  %v4893_v23 = vpack.c.bf16 %v1936_v21, %v1936_v21 }
 0xfa8   :  { %2214 = vrot.lane.b32.xlu1 %v4893_v23, %s4330_s10 }
 0xfac   :  { %2263 = vrot.lane.b32.xlu1 %v4897_v24, %s4330_s10 }
 0xfad   :  { %v2051_v1 = vpop.f32.mrb[52].mxu0 }
 0xfae   :  { %v4901_v55 = vpack.c.bf16 %v2051_v1, %v2051_v1  ;;  %v3954_v26 = vpop.f32.mrb[53].mxu0 }
 0xfaf   :  { %v2054_v27 = vpop.f32.mrb[54].mxu0 }
 0xfb0   :  { %v4903_v5 = vpack.c.bf16 %v2054_v27, %v2054_v27  ;;  %2361 = vrot.lane.b32.xlu1 %v4901_v55, %s4330_s10  ;;  %v3955_v37 = vpop.f32.mrb[55].mxu0 }
 0xfb2   :  { %2410 = vrot.lane.b32.xlu0 %v4903_v5, %s4330_s10 }
 0xfb4   :  { %2554 = vrot.lane.b32.xlu1 %v2058_v4, %s4331_s11 }
0x100a   :  { %v2068_v28 = vpop.permute.xlu1 %2067 }
0x100b   :  { %v2073_v29 = vsel %vm503_vm3, %v2068_v28, 0 }
0x100c   :  { %3957 = vmatpush3.bf16.xpose.msra.mxu1 %v2073_v29  ;;  %v2117_v30 = vpop.permute.xlu0 %2116 }
0x100d   :  { %v2122_v40 = vsel %vm503_vm3, %v2117_v30, 0  ;;  %3968 = vmatprep.subr.bf16.mxu1 %v4328_v15 }
0x100e   :  { %3963 = vmatpush3.bf16.xpose.msra.mxu0 %v2122_v40 }
0x100f   :  { %3974 = vmatprep.subr.bf16.mxu0 %v4328_v15 }
0x1010   :  { %v2313_v38 = vpop.permute.xlu0 %2312 }
0x1011   :  { %v2318_v39 = vsel %vm503_vm3, %v2313_v38, 0 }
0x1013   :  { %3959 = vmatmul.mubr.msk.bf16.vlgmr.msra.gmra.mrb[56].mxu1 %vm503_vm3, %v2058_v4 }
0x1014   :  { %3970 = vmatprep.mubr.msk.bf16.mxu1 %vm4329_vm1, %v4328_v15 }
0x1015   :  { %3965 = vmatmul.mubr.msk.bf16.vlgmr.msra.gmra.mrb[56].mxu0 %vm503_vm3, %v4880_v13 }
0x1016   :  { %v2166_v31 = vpop.permute.xlu1 %2165  ;;  %3976 = vmatprep.mubr.msk.bf16.mxu0 %vm4329_vm1, %v4328_v15 }
0x1017   :  { %v2171_v32 = vsel %vm503_vm3, %v2166_v31, 0 }
0x1018   :  { %3969 = vmatpush3.bf16.xpose.msra.mxu1 %v2171_v32 }
0x1019   :  { %3980 = vmatprep.subr.bf16.mxu1 %v4328_v15 }
0x101a   :  { %v2215_v33 = vpop.permute.xlu1 %2214 }
0x101b   :  { %v2220_v34 = vsel %vm503_vm3, %v2215_v33, 0 }
0x101c   :  { %3975 = vmatpush3.bf16.xpose.msra.mxu0 %v2220_v34 }
0x101d   :  { %3986 = vmatprep.subr.bf16.mxu0 %v4328_v15 }
0x101e   :  { %v2264_v35 = vpop.permute.xlu1 %2263 }
0x101f   :  { %v2269_v36 = vsel %vm503_vm3, %v2264_v35, 0  ;;  %3971 = vmatmul.mubr.msk.bf16.vlgmr.msra.gmra.mrb[60].mxu1 %vm503_vm3, %v4889_v19 }
0x1020   :  { %3981 = vmatpush3.bf16.xpose.msra.mxu1 %v2269_v36  ;;  %3982 = vmatprep.mubr.msk.bf16.mxu1 %vm4329_vm1, %v4328_v15 }
0x1021   :  { %3992 = vmatprep.subr.bf16.mxu1 %v4328_v15 }
0x1022   :  { %v2362_v41 = vpop.permute.xlu1 %2361 }
0x1023   :  { %3977 = vmatmul.mubr.msk.bf16.vlgmr.msra.gmra.mrb[60].mxu0 %vm503_vm3, %v4893_v23  ;;  %v2367_v42 = vsel %vm503_vm3, %v2362_v41, 0 }
0x1024   :  { %3987 = vmatpush3.bf16.xpose.msra.mxu0 %v2318_v39  ;;  %3988 = vmatprep.mubr.msk.bf16.mxu0 %vm4329_vm1, %v4328_v15  ;;  %v2411_v43 = vpop.permute.xlu0 %2410 }
0x1025   :  { %3998 = vmatprep.subr.bf16.mxu0 %v4328_v15  ;;  %v2416_v44 = vsel %vm503_vm3, %v2411_v43, 0 }
0x1026   :  { %v2555_v45 = vpop.permute.xlu1 %2554 }
0x1027   :  { %3983 = vmatmul.mubr.msk.bf16.vlgmr.msra.gmra.mrb[64].mxu1 %vm503_vm3, %v4897_v24  ;;  %v2560_v6 = vsel %vm995_vm5, %v2555_v45, 0 }
0x1028   :  { %3993 = vmatpush3.bf16.xpose.msra.mxu1 %v2367_v42  ;;  %3994 = vmatprep.mubr.msk.bf16.mxu1 %vm4329_vm1, %v4328_v15 }
0x1029   :  { %4004 = vmatprep.subr.bf16.mxu1 %v4328_v15 }
0x102b   :  { %3989 = vmatmul.mubr.msk.bf16.vlgmr.msra.gmra.mrb[64].mxu0 %vm503_vm3, %v4885_v17 }
0x102c   :  { %3999 = vmatpush3.bf16.xpose.msra.mxu0 %v2416_v44  ;;  %4000 = vmatprep.mubr.msk.bf16.mxu0 %vm4329_vm1, %v4328_v15 }
0x102d   :  { %4010 = vmatprep.subr.bf16.mxu0 %v4328_v15 }
0x102f   :  { %3995 = vmatmul.mubr.msk.bf16.vlgmr.msra.gmra.mrb[68].mxu1 %vm503_vm3, %v4901_v55 }
0x1030   :  { %4005 = vmatpush3.bf16.msra.mxu1 %v2560_v6  ;;  %4006 = vmatprep.mubr.msk.bf16.mxu1 %vm4329_vm1, %v4328_v15 }
0x1031   :  { %4016 = vmatprep.subr.bf16.mxu1 %v4328_v15 }
0x1033   :  { %4001 = vmatmul.mubr.msk.bf16.vlgmr.msra.gmra.mrb[68].mxu0 %vm503_vm3, %v4903_v5 }
0x1034   :  { %4012 = vmatprep.mubr.msk.bf16.mxu0 %vm4329_vm1, %v4328_v15 }
0x10e6   :  { %v2109_v8 = vpop.f32.mrb[56].mxu1 }
0x10e7   :  { %v3960_v46 = vpop.f32.mrb[57].mxu1  ;;  %v2458_v47 = vsel %vm893_vm4, %v2109_v8, -inf }
0x10e8   :  { %v2112_v63 = vpop.f32.mrb[58].mxu1  ;;  %2459 = vmax.xlane.f32.xlu1 %v2458_v47  ;;  %v2158_v11 = vpop.f32.mrb[56].mxu0 }
0x10e9   :  { %v3961_v48 = vpop.f32.mrb[59].mxu1  ;;  %v3966_v49 = vpop.f32.mrb[57].mxu0  ;;  %v2461_v50 = vsel %vm893_vm4, %v2158_v11, -inf }
0x10ea   :  { %2462 = vmax.xlane.f32.xlu0 %v2461_v50  ;;  %v2161_v51 = vpop.f32.mrb[58].mxu0 }
0x10eb   :  { %v3967_v52 = vpop.f32.mrb[59].mxu0 }
0x10f2   :  { %v4961_v53 = vpop.f32.mrb[60].mxu1 }
0x10f3   :  { %v3972_v54 = vpop.f32.mrb[61].mxu1  ;;  %v2464_v56 = vsel %vm893_vm4, %v4961_v53, -inf }
0x10f4   :  { %v2210_v57 = vpop.f32.mrb[62].mxu1  ;;  %2465 = vmax.xlane.f32.xlu0 %v2464_v56 }
0x10f5   :  { %v3973_v58 = vpop.f32.mrb[63].mxu1 }
0x10f6   :  { %v2256_v59 = vpop.f32.mrb[60].mxu0 }
0x10f7   :  { %v3978_v61 = vpop.f32.mrb[61].mxu0  ;;  %v2467_v0 = vsel %vm893_vm4, %v2256_v59, -inf }
0x10f8   :  { %2468 = vmax.xlane.f32.xlu0 %v2467_v0  ;;  %v2259_v2 = vpop.f32.mrb[62].mxu0 }
0x10f9   :  { %v3979_v3 = vpop.f32.mrb[63].mxu0 }
0x10fa   :  { %v4966_v4 = vpop.f32.mrb[64].mxu1 }
0x10fb   :  { %v3984_v7 = vpop.f32.mrb[65].mxu1  ;;  %v2470_v10 = vsel %vm893_vm4, %v4966_v4, -inf }
0x10fc   :  { %v2308_v12 = vpop.f32.mrb[66].mxu1  ;;  %2471 = vmax.xlane.f32.xlu1 %v2470_v10 }
0x10fd   :  { %v3985_v9 = vpop.f32.mrb[67].mxu1 }
0x10fe   :  { %v4970_v14 = vpop.f32.mrb[64].mxu0 }
0x10ff   :  { %v3990_v16 = vpop.f32.mrb[65].mxu0  ;;  %v2473_v18 = vsel %vm893_vm4, %v4970_v14, -inf }
0x1100   :  { %2474 = vmax.xlane.f32.xlu0 %v2473_v18  ;;  %v2357_v20 = vpop.f32.mrb[66].mxu0 }
0x1101   :  { %v3991_v21 = vpop.f32.mrb[67].mxu0 }
0x1102   :  { %v2403_v22 = vpop.f32.mrb[68].mxu1 }
0x1103   :  { %v3996_v1 = vpop.f32.mrb[69].mxu1  ;;  %v2476_v26 = vsel %vm893_vm4, %v2403_v22, -inf }
0x1104   :  { %2477 = vmax.xlane.f32.xlu1 %v2476_v26  ;;  %v2406_v27 = vpop.f32.mrb[70].mxu1 }
0x1105   :  { %v3997_v37 = vpop.f32.mrb[71].mxu1 }
0x1106   :  { %v2452_v28 = vpop.f32.mrb[68].mxu0 }
0x1107   :  { %v4002_v29 = vpop.f32.mrb[69].mxu0  ;;  %v2479_v30 = vsel %vm893_vm4, %v2452_v28, -inf }
0x1108   :  { %2480 = vmax.xlane.f32.xlu0 %v2479_v30  ;;  %v2455_v40 = vpop.f32.mrb[70].mxu0 }
0x1109   :  { %v4003_v31 = vpop.f32.mrb[71].mxu0 }
0x1115   :  { %2650 = vrot.lane.b32.xlu1 %v4889_v19, %s4331_s11 }
0x1119   :  { %2698 = vrot.lane.b32.xlu1 %v4893_v23, %s4331_s11 }
0x111e   :  { %2602 = vrot.lane.b32.xlu0 %v4880_v13, %s4331_s11 }
0x1175   :  { %v2460_v32 = vpop.xlane.xlu1 %2459 }
0x1176   :  { %v2482_v33 = vsub.f32 %v2109_v8, %v2460_v32 }
0x1177   :  { %v2463_v34 = vpop.xlane.xlu0 %2462 }
0x1178   :  { %v2490_v35 = vmul.f32 1.442695, %v2482_v33  ;;  %v2483_v36 = vsub.f32 %v2158_v11, %v2463_v34 }
0x117a   :  { %4256 = vpow2.f32 %v2490_v35  ;;  %v2492_v38 = vmul.f32 1.442695, %v2483_v36 }
0x117c   :  { %4258 = vpow2.f32 %v2492_v38 }
0x1181   :  { %v2466_v39 = vpop.xlane.xlu0 %2465 }
0x1182   :  { %v2484_v11 = vsub.f32 %v4961_v53, %v2466_v39 }
0x1184   :  { %v4257_v41 = vpop.eup %4256  ;;  %v2494_v49 = vmul.f32 1.442695, %v2484_v11 }
0x1185   :  { %v2469_v42 = vpop.xlane.xlu0 %2468  ;;  %v2506_v43 = vsel %vm893_vm4, %v4257_v41, 0.0 }
0x1186   :  { %v4259_v19 = vpop.eup %4258  ;;  %v2485_v44 = vsub.f32 %v2256_v59, %v2469_v42  ;;  %2507 = vadd.xlane.f32.xlu1 %v2506_v43 }
0x1187   :  { %v2509_v23 = vsel %vm893_vm4, %v4259_v19, 0.0 }
0x1188   :  { %v2496_v45 = vmul.f32 1.442695, %v2485_v44  ;;  %2510 = vadd.xlane.f32.xlu0 %v2509_v23 }
0x1189   :  { %v2472_v48 = vpop.xlane.xlu1 %2471 }
0x118a   :  { %4260 = vpow2.f32 %v2496_v45  ;;  %v2486_v50 = vsub.f32 %v4966_v4, %v2472_v48 }
0x118b   :  { %4262 = vpow2.f32 %v2494_v49 }
0x118c   :  { %v2498_v52 = vmul.f32 1.442695, %v2486_v50 }
0x118d   :  { %v2475_v13 = vpop.xlane.xlu0 %2474 }
0x118e   :  { %4264 = vpow2.f32 %v2498_v52  ;;  %v2487_v56 = vsub.f32 %v4970_v14, %v2475_v13 }
0x1190   :  { %v2500_v58 = vmul.f32 1.442695, %v2487_v56 }
0x1191   :  { %v2478_v51 = vpop.xlane.xlu1 %2477 }
0x1192   :  { %v2488_v54 = vsub.f32 %v2403_v22, %v2478_v51 }
0x1194   :  { %v4984_v6 = vpop.eup %4260 }
0x1195   :  { %v2481_v8 = vpop.xlane.xlu0 %2480  ;;  %v2515_v46 = vsel %vm893_vm4, %v4984_v6, 0.0  ;;  %v4263_v57 = vpop.eup %4262 }
0x1196   :  { %2516 = vadd.xlane.f32.xlu0 %v2515_v46  ;;  %v2489_v59 = vsub.f32 %v2452_v28, %v2481_v8  ;;  %v2512_v53 = vsel %vm893_vm4, %v4263_v57, 0.0  ;;  %v2651_v9 = vpop.permute.xlu1 %2650 }
0x1197   :  { %2746 = vrot.lane.b32.xlu1 %v4897_v24, %s4331_s11  ;;  %v2502_v24 = vmul.f32 1.442695, %v2488_v54  ;;  %v2656_v27 = vsel %vm995_vm5, %v2651_v9, 0 }
0x1198   :  { %v4998_v61 = vpop.eup %4264  ;;  %v2504_v0 = vmul.f32 1.442695, %v2489_v59 }
0x1199   :  { %v2603_v47 = vpop.permute.xlu0 %2602  ;;  %4266 = vpow2.f32 %v2502_v24 }
0x119a   :  { %v2608_v63 = vsel %vm995_vm5, %v2603_v47, 0  ;;  %4268 = vpow2.f32 %v2500_v58  ;;  %v2699_v14 = vpop.permute.xlu1 %2698 }
0x119b   :  { %4011 = vmatpush3.bf16.msra.mxu0 %v2608_v63  ;;  %4270 = vpow2.f32 %v2504_v0 }
0x119c   :  { %4022 = vmatprep.subr.bf16.mxu0 %v4328_v15 }
0x11a3   :  { %v5002_v2 = vpop.eup %4266 }
0x11a4   :  { %v2524_v3 = vsel %vm893_vm4, %v5002_v2, 0.0  ;;  %v5006_v4 = vpop.eup %4268 }
0x11a5   :  { %v2521_v7 = vsel %vm893_vm4, %v5006_v4, 0.0  ;;  %v5010_v10 = vpop.eup %4270 }
0x11a6   :  { %v2527_v12 = vsel %vm893_vm4, %v5010_v10, 0.0 }
0x11ac   :  { %2794 = vrot.lane.b32.xlu0 %v4885_v17, %s4331_s11  ;;  %v2518_v17 = vsel %vm893_vm4, %v4998_v61, 0.0 }
0x11bb   :  { %2513 = vadd.xlane.f32.xlu1 %v2512_v53 }
0x11bf   :  { %2519 = vadd.xlane.f32.xlu1 %v2518_v17 }
0x11c3   :  { %2525 = vadd.xlane.f32.xlu1 %v2524_v3 }
0x11cb   :  { %2522 = vadd.xlane.f32.xlu0 %v2521_v7 }
0x11cf   :  { %2528 = vadd.xlane.f32.xlu0 %v2527_v12 }
0x11d4   :  { %2842 = vrot.lane.b32.xlu1 %v4901_v55, %s4331_s11 }
0x11e5   :  { %2890 = vrot.lane.b32.xlu0 %v4903_v5, %s4331_s11  ;;  %v2704_v5 = vsel %vm995_vm5, %v2699_v14, 0 }
0x1213   :  { %v2508_v16 = vpop.xlane.xlu1 %2507 }
0x1214   :  { %4272 = vrcp.f32 %v2508_v16  ;;  %v4181_v16 = vld [vmem:[%s5197_s2 + $0x150] sm:$0xff]  }
0x1215   :  { %v2511_v18 = vpop.xlane.xlu0 %2510 }
0x1216   :  { %4274 = vrcp.f32 %v2511_v18 }
0x1217   :  { %v2747_v32 = vpop.permute.xlu1 %2746 }
0x1218   :  { %v2752_v42 = vsel %vm995_vm5, %v2747_v32, 0 }
0x121e   :  { %v4273_v20 = vpop.eup %4272 }
0x121f   :  { %v2531_v21 = vmul.f32 %v4273_v20, %v4257_v41 }
0x1220   :  { %v4275_v22 = vpop.eup %4274 }
0x1221   :  { %v2533_v1 = vmul.f32 %v4275_v22, %v4259_v19  ;;  %v2546_v26 = vpack.c.bf16 %v2531_v21, %v2531_v21  ;;  %v4182_v21 = vld [vmem:[%s5197_s2 + $0x158] sm:$0xff]  }
0x1223   :  { %v2517_v37 = vpop.xlane.xlu0 %2516  ;;  %4007 = vmatmul.mubr.msk.bf16.vlgmr.msra.gmra.mrb[72].mxu1 %vm893_vm4, %v2546_v26  ;;  %v2547_v55 = vpack.c.bf16 %v2533_v1, %v2533_v1  ;;  %v4183_v26 = vld [vmem:[%s5197_s2 + $0x160] sm:$0xff]  }
0x1224   :  { %4276 = vrcp.f32 %v2517_v37  ;;  %4017 = vmatpush3.bf16.msra.mxu1 %v2656_v27  ;;  %4018 = vmatprep.mubr.msk.bf16.mxu1 %vm4329_vm1, %v4328_v15 }
0x1225   :  { %4013 = vmatmul.mubr.msk.bf16.vlgmr.msra.gmra.mrb[72].mxu0 %vm893_vm4, %v2547_v55  ;;  %4028 = vmatprep.subr.bf16.mxu1 %v4328_v15 }
0x1226   :  { %4023 = vmatpush3.bf16.msra.mxu0 %v2704_v5  ;;  %4024 = vmatprep.mubr.msk.bf16.mxu0 %vm4329_vm1, %v4328_v15 }
0x1227   :  { %4034 = vmatprep.subr.bf16.mxu0 %v4328_v15  ;;  %v2795_v30 = vpop.permute.xlu0 %2794 }
0x1228   :  { %v2800_v31 = vsel %vm995_vm5, %v2795_v30, 0 }
0x122e   :  { %v4277_v28 = vpop.eup %4276 }
0x122f   :  { %v2537_v29 = vmul.f32 %v4277_v28, %v4984_v6 }
0x1231   :  { %v2549_v40 = vpack.c.bf16 %v2537_v29, %v2537_v29 }
0x1233   :  { %4025 = vmatmul.mubr.msk.bf16.vlgmr.msra.gmra.mrb[76].mxu0 %vm893_vm4, %v2549_v40 }
0x1234   :  { %4035 = vmatpush3.bf16.msra.mxu0 %v2800_v31  ;;  %4036 = vmatprep.mubr.msk.bf16.mxu0 %vm4329_vm1, %v4328_v15 }
0x1235   :  { %4046 = vmatprep.subr.bf16.mxu0 %v4328_v15 }
0x1248   :  { %v2514_v33 = vpop.xlane.xlu1 %2513 }
0x1249   :  { %4278 = vrcp.f32 %v2514_v33 }
0x124c   :  { %v2520_v34 = vpop.xlane.xlu1 %2519 }
0x124d   :  { %4280 = vrcp.f32 %v2520_v34 }
0x1250   :  { %v2526_v35 = vpop.xlane.xlu1 %2525 }
0x1251   :  { %4282 = vrcp.f32 %v2526_v35 }
0x1253   :  { %v4279_v36 = vpop.eup %4278 }
0x1254   :  { %v2535_v38 = vmul.f32 %v4279_v36, %v4263_v57  ;;  %v2843_v23 = vpop.permute.xlu1 %2842 }
0x1255   :  { %v2848_v6 = vsel %vm995_vm5, %v2843_v23, 0 }
0x1256   :  { %v2548_v39 = vpack.c.bf16 %v2535_v38, %v2535_v38 }
0x1257   :  { %v4281_v41 = vpop.eup %4280 }
0x1258   :  { %v2523_v43 = vpop.xlane.xlu0 %2522  ;;  %4019 = vmatmul.mubr.msk.bf16.vlgmr.msra.gmra.mrb[76].mxu1 %vm893_vm4, %v2548_v39  ;;  %v2539_v19 = vmul.f32 %v4281_v41, %v4998_v61 }
0x1259   :  { %4284 = vrcp.f32 %v2523_v43  ;;  %4029 = vmatpush3.bf16.msra.mxu1 %v2752_v42  ;;  %4030 = vmatprep.mubr.msk.bf16.mxu1 %vm4329_vm1, %v4328_v15 }
0x125a   :  { %4040 = vmatprep.subr.bf16.mxu1 %v4328_v15  ;;  %v2550_v45 = vpack.c.bf16 %v2539_v19, %v2539_v19 }
0x125b   :  { %v4283_v13 = vpop.eup %4282 }
0x125c   :  { %v2529_v44 = vpop.xlane.xlu0 %2528  ;;  %v2543_v8 = vmul.f32 %v4283_v13, %v5002_v2 }
0x125d   :  { %4286 = vrcp.f32 %v2529_v44 }
0x125e   :  { %v2552_v48 = vpack.c.bf16 %v2543_v8, %v2543_v8 }
0x1260   :  { %4031 = vmatmul.mubr.msk.bf16.vlgmr.msra.gmra.mrb[80].mxu1 %vm893_vm4, %v2550_v45  ;;  %v2891_v63 = vpop.permute.xlu0 %2890 }
0x1261   :  { %4041 = vmatpush3.bf16.msra.mxu1 %v2848_v6  ;;  %4042 = vmatprep.mubr.msk.bf16.mxu1 %vm4329_vm1, %v4328_v15  ;;  %v2896_v50 = vsel %vm995_vm5, %v2891_v63, 0 }
0x1262   :  { %4052 = vmatprep.subr.bf16.mxu1 %v4328_v15 }
0x1263   :  { %v4285_v46 = vpop.eup %4284 }
0x1264   :  { %v2541_v47 = vmul.f32 %v4285_v46, %v5006_v4  ;;  %v4180_v4 = vld [vmem:[%s5197_s2 + $0x148] sm:$0xff]  }
0x1266   :  { %v2551_v11 = vpack.c.bf16 %v2541_v47, %v2541_v47 }
0x1267   :  { %v4287_v49 = vpop.eup %4286 }
0x1268   :  { %4037 = vmatmul.mubr.msk.bf16.vlgmr.msra.gmra.mrb[80].mxu0 %vm893_vm4, %v2551_v11  ;;  %4043 = vmatmul.mubr.msk.bf16.vlgmr.msra.gmra.mrb[84].mxu1 %vm893_vm4, %v2552_v48  ;;  %v2545_v51 = vmul.f32 %v4287_v49, %v5010_v10 }
0x1269   :  { %4047 = vmatpush3.bf16.msra.mxu0 %v2896_v50  ;;  %4048 = vmatprep.mubr.msk.bf16.mxu0 %vm4329_vm1, %v4328_v15 }
0x126a   :  { %4060 = vmatprep.mubr.msk.bf16.mxu1 %vm4329_vm1, %v4328_v15  ;;  %4064 = vmatprep.subr.bf16.mxu0 %v4328_v15  ;;  %v2553_v52 = vpack.c.bf16 %v2545_v51, %v2545_v51 }
0x126b   :  { %4053 = vmatpush3.bf16.msra.mxu1 %v4180_v4  ;;  %v4185_v4 = vld [vmem:[%s5197_s2 + $0x170] sm:$0xff]  }
0x126c   :  { %4054 = vmatprep.subr.bf16.mxu1 %v4328_v15 }
0x126f   :  { %4055 = vmatpush3.bf16.msra.mxu1 %v4181_v16 }
0x1270   :  { %4049 = vmatmul.mubr.msk.bf16.vlgmr.msra.gmra.mrb[84].mxu0 %vm893_vm4, %v2553_v52  ;;  %4056 = vmatprep.subr.bf16.mxu1 %v4328_v15 }
0x1271   :  { %4070 = vmatprep.mubr.msk.bf16.mxu0 %vm4329_vm1, %v4328_v15 }
0x1273   :  { %4057 = vmatpush3.bf16.msra.mxu1 %v4182_v21 }
0x1274   :  { %4058 = vmatprep.subr.bf16.mxu1 %v4328_v15 }
0x1277   :  { %4059 = vmatpush3.bf16.msra.mxu1 %v4183_v26 }
0x1278   :  { %4090 = vmatprep.subr.bf16.mxu1 %v4328_v15 }
0x12f6   :  { %v2596_v54 = vpop.f32.mrb[72].mxu1 }
0x12f7   :  { %v4008_v24 = vpop.f32.mrb[73].mxu1 }
0x12f8   :  { %v2599_v56 = vpop.f32.mrb[74].mxu1  ;;  %v2644_v57 = vpop.f32.mrb[72].mxu0 }
0x12f9   :  { %v4009_v58 = vpop.f32.mrb[75].mxu1  ;;  %v4014_v59 = vpop.f32.mrb[73].mxu0 }
0x12fa   :  { %v2647_v53 = vpop.f32.mrb[74].mxu0 }
0x12fb   :  { %v4015_v61 = vpop.f32.mrb[75].mxu0 }
0x1306   :  { %v2740_v0 = vpop.f32.mrb[76].mxu0 }
0x1307   :  { %v4026_v17 = vpop.f32.mrb[77].mxu0 }
0x1308   :  { %v2743_v2 = vpop.f32.mrb[78].mxu0 }
0x1309   :  { %v4027_v3 = vpop.f32.mrb[79].mxu0 }
0x130a   :  { %v4184_v3 = vld [vmem:[%s5197_s2 + $0x168] sm:$0xff]  }
0x130b   :  { %4065 = vmatpush3.bf16.msra.mxu0 %v4184_v3 }
0x130c   :  { %4066 = vmatprep.subr.bf16.mxu0 %v4328_v15 }
0x130f   :  { %4067 = vmatpush3.bf16.msra.mxu0 %v4185_v4 }
0x1310   :  { %4068 = vmatprep.subr.bf16.mxu0 %v4328_v15 }
0x132b   :  { %v2692_v7 = vpop.f32.mrb[76].mxu1 }
0x132c   :  { %v4124_v10 = vpack.i.bf16 %v2740_v0, %v2692_v7  ;;  %v4020_v12 = vpop.f32.mrb[77].mxu1  ;;  %v4186_v7 = vld [vmem:[%s5197_s2 + $0x178] sm:$0xff]  }
0x132d   :  { %v2695_v9 = vpop.f32.mrb[78].mxu1  ;;  %4069 = vmatpush3.bf16.msra.mxu0 %v4186_v7 }
0x132e   :  { %v4021_v14 = vpop.f32.mrb[79].mxu1  ;;  %4125 = vrot.lane.b32.xlu1 %v4124_v10, %s4332_s14  ;;  %4074 = vmatprep.subr.bf16.mxu0 %v4328_v15 }
0x1333   :  { %v2788_v18 = vpop.f32.mrb[80].mxu1 }
0x1334   :  { %v4032_v20 = vpop.f32.mrb[81].mxu1 }
0x1335   :  { %v2791_v22 = vpop.f32.mrb[82].mxu1 }
0x1336   :  { %v4033_v1 = vpop.f32.mrb[83].mxu1  ;;  %v3571_v22 = vld [vmem:[%s5196_s1 + $0x1d] ss:$0 sm:$0xff] }
0x133b   :  { %v2836_v27 = vpop.f32.mrb[80].mxu0  ;;  %v2884_v37 = vpop.f32.mrb[84].mxu1 }
0x133c   :  { %v4129_v55 = vpack.i.bf16 %v2836_v27, %v2788_v18  ;;  %v4038_v5 = vpop.f32.mrb[81].mxu0  ;;  %v4044_v28 = vpop.f32.mrb[85].mxu1 }
0x133d   :  { %v2839_v29 = vpop.f32.mrb[82].mxu0  ;;  %v2887_v30 = vpop.f32.mrb[86].mxu1 }
0x133e   :  { %4130 = vrot.lane.b32.xlu0 %v4129_v55, %s4333_s18  ;;  %v4039_v40 = vpop.f32.mrb[83].mxu0  ;;  %v4045_v31 = vpop.f32.mrb[87].mxu1  ;;  %v4187_v30 = vld [vmem:[%s5197_s2 + $0x180] sm:$0xff]  }
0x133f   :  { %v4188_v40 = vld [vmem:[%s5197_s2 + $0x188] sm:$0xff]   ;;  %v4189_v31 = vld [vmem:[%s5197_s2 + $0x190] sm:$0xff]  }
0x1343   :  { %v2932_v32 = vpop.f32.mrb[84].mxu0 }
0x1344   :  { %v4134_v33 = vpack.i.bf16 %v2932_v32, %v2884_v37  ;;  %v4050_v34 = vpop.f32.mrb[85].mxu0  ;;  %v3572_v37 = vld [vmem:[%s5196_s1 + $0x1e] ss:$0 sm:$0xff] }
0x1345   :  { %v2935_v35 = vpop.f32.mrb[86].mxu0  ;;  %v4190_v32 = vld [vmem:[%s5197_s2 + $0x198] sm:$0xff]   ;;  %v4192_v34 = vld [vmem:[%s5197_s2 + $0x1a8] sm:$0xff]  }
0x1346   :  { %4135 = vrot.lane.b32.xlu1 %v4134_v33, %s4334_s21  ;;  %v4051_v36 = vpop.f32.mrb[87].mxu0  ;;  %v4191_v33 = vld [vmem:[%s5197_s2 + $0x1a0] sm:$0xff]   ;;  %v3573_v35 = vld [vmem:[%s5196_s1 + $0x1f] ss:$0 sm:$0xff] }
0x13a0   :  { %v4126_v38 = vpop.permute.xlu1 %4125 }
0x13a1   :  { %v4128_v41 = vunpack.i.h.bf16 %v4126_v38  ;;  %v4127_v42 = vunpack.i.l.bf16 %v4126_v38 }
0x13a3   :  { %v2963_v23 = vsel %vm503_vm3, %v2644_v57, %v4128_v41  ;;  %v2962_v45 = vsel %vm503_vm3, %v2596_v54, %v4127_v42 }
0x13b0   :  { %v4131_v39 = vpop.permute.xlu0 %4130 }
0x13b1   :  { %v4133_v43 = vunpack.i.h.bf16 %v4131_v39  ;;  %v4132_v19 = vunpack.i.l.bf16 %v4131_v39 }
0x13b3   :  { %v2965_v8 = vsel %vm1401_vm6, %v2963_v23, %v4133_v43  ;;  %v2964_v46 = vsel %vm1401_vm6, %v2962_v45, %v4132_v19 }
0x13b8   :  { %v4136_v44 = vpop.permute.xlu1 %4135 }
0x13b9   :  { %v4138_v13 = vunpack.i.h.bf16 %v4136_v44  ;;  %v4137_v6 = vunpack.i.l.bf16 %v4136_v44 }
0x13bb   :  { %v2967_v47 = vsel %vm144_vm2, %v2965_v8, %v4138_v13  ;;  %v2966_v63 = vsel %vm144_vm2, %v2964_v46, %v4137_v6 }
0x13bc   :  { %v2976_v11 = vpack.c.bf16 %v2967_v47, %v2966_v63 }
0x13be   :  { %4061 = vmatmul.mubr.msk.bf16.vlgmr.msra.gmra.mrb[88].mxu1 %vm20_vm0, %v2976_v11 }
0x13bf   :  { %4096 = vmatprep.mubr.msk.bf16.mxu1 %vm4329_vm1, %v4328_v15 }
0x1491   :  { %v3038_v48 = vpop.f32.mrb[88].mxu1 }
0x1492   :  { %v5088_v49 = vadd.f32 %v3038_v48, %v4801_v60  ;;  %v4062_v50 = vpop.f32.mrb[89].mxu1 }
0x1493   :  { %v3041_v51 = vpop.f32.mrb[90].mxu1 }
0x1494   :  { %v5091_v52 = vadd.f32 %v3041_v51, %v4804_v25  ;;  %v4063_v54 = vpop.f32.mrb[91].mxu1  ;;  %v3049_v24 = vsel %vm144_vm2, %v5088_v49, 0.0 }
0x1495   :  { %3050 = vadd.xlane.f32.xlu0 %v3049_v24 }
0x1496   :  { %v3052_v56 = vsel %vm144_vm2, %v5091_v52, 0.0 }
0x1497   :  { %3053 = vadd.xlane.f32.xlu1 %v3052_v56 }
0x1522   :  { %v3051_v57 = vpop.xlane.xlu0 %3050 }
0x1523   :  { %v3055_v58 = vmul.f32 0.020833334, %v3051_v57 }
0x1524   :  { %v3054_v59 = vpop.xlane.xlu1 %3053 }
0x1525   :  { %v3057_v60 = vsub.f32 %v5088_v49, %v3055_v58  ;;  %v3056_v53 = vmul.f32 0.020833334, %v3054_v59 }
0x1527   :  { %v3058_v61 = vsub.f32 %v5091_v52, %v3056_v53  ;;  %v3059_v0 = vmul.f32 %v3057_v60, %v3057_v60 }
0x1529   :  { %v3061_v25 = vsel %vm144_vm2, %v3059_v0, 0.0  ;;  %v3060_v17 = vmul.f32 %v3058_v61, %v3058_v61 }
0x152a   :  { %3062 = vadd.xlane.f32.xlu0 %v3061_v25 }
0x152b   :  { %v3064_v2 = vsel %vm144_vm2, %v3060_v17, 0.0 }
0x152e   :  { %3065 = vadd.xlane.f32.xlu0 %v3064_v2 }
0x15b7   :  { %v3063_v10 = vpop.xlane.xlu0 %3062 }
0x15b8   :  { %v3067_v12 = vmul.f32 0.020833334, %v3063_v10 }
0x15ba   :  { %v3069_v9 = vadd.f32 1e-05, %v3067_v12 }
0x15bb   :  { %v3066_v14 = vpop.xlane.xlu0 %3065 }
0x15bc   :  { %4288 = vrsqrt.f32 %v3069_v9  ;;  %v3068_v16 = vmul.f32 0.020833334, %v3066_v14 }
0x15be   :  { %v3070_v18 = vadd.f32 1e-05, %v3068_v16 }
0x15c0   :  { %4290 = vrsqrt.f32 %v3070_v18 }
0x15c6   :  { %v4289_v20 = vpop.eup %4288 }
0x15c7   :  { %v3073_v21 = vmul.f32 %v4289_v20, %v3057_v60 }
0x15c9   :  { %v3079_v26 = vmul.f32 %v3571_v22, %v3073_v21 }
0x15ca   :  { %v4291_v1 = vpop.eup %4290 }
0x15cb   :  { %v3074_v27 = vmul.f32 %v4291_v1, %v3058_v61  ;;  %v3085_v5 = vadd.f32 %v3572_v37, %v3079_v26 }
0x15cd   :  { %v3080_v55 = vmul.f32 %v3571_v22, %v3074_v27 }
0x15cf   :  { %v3086_v28 = vadd.f32 %v3572_v37, %v3080_v55 }
0x15d1   :  { %v3093_v29 = vpack.c.bf16 %v3086_v28, %v3085_v5 }
0x15d3   :  { %4071 = vmatmul.mubr.msk.bf16.vlgmr.msra.gmra.mrb[88].mxu0 %vm144_vm2, %v3093_v29 }
0x15d4   :  { %4086 = vmatprep.mubr.msk.bf16.mxu0 %vm4329_vm1, %v4328_v15  ;;  %4075 = vmatpush3.bf16.msra.mxu0 %v4187_v30 }
0x15d5   :  { %4076 = vmatprep.subr.bf16.mxu0 %v4328_v15 }
0x15d8   :  { %4077 = vmatpush3.bf16.msra.mxu0 %v4188_v40 }
0x15d9   :  { %4078 = vmatprep.subr.bf16.mxu0 %v4328_v15 }
0x15dc   :  { %4079 = vmatpush3.bf16.msra.mxu0 %v4189_v31 }
0x15dd   :  { %4080 = vmatprep.subr.bf16.mxu0 %v4328_v15 }
0x15e0   :  { %4081 = vmatpush3.bf16.msra.mxu0 %v4190_v32 }
0x15e1   :  { %4082 = vmatprep.subr.bf16.mxu0 %v4328_v15 }
0x15e4   :  { %4083 = vmatpush3.bf16.msra.mxu0 %v4191_v33 }
0x15e5   :  { %4084 = vmatprep.subr.bf16.mxu0 %v4328_v15 }
0x15e8   :  { %4085 = vmatpush3.bf16.msra.mxu0 %v4192_v34  ;;  %v3585_v34 = vld [vmem:[%s5196_s1 + $0x20] ss:$0 sm:$0xff] }
0x16a6   :  { %v3154_v36 = vpop.f32.mrb[88].mxu0 }
0x16a7   :  { %v3155_v38 = vadd.f32 %v3573_v35, %v3154_v36  ;;  %v4072_v39 = vpop.f32.mrb[89].mxu0 }
0x16a8   :  { %v3157_v41 = vpop.f32.mrb[90].mxu0 }
0x16a9   :  { %v3163_v42 = vmul.f32 0.70710677, %v3155_v38  ;;  %v3158_v43 = vadd.f32 %v3573_v35, %v3157_v41  ;;  %v4073_v19 = vpop.f32.mrb[91].mxu0  ;;  %v3161_v28 = vmul.f32 0.5, %v3155_v38 }
0x16ab   :  { %v3169_v44 = vand.u32 2147483647, %v3163_v42  ;;  %v3164_v23 = vmul.f32 0.70710677, %v3158_v43  ;;  %vm3165_vm10 = vcmp.ge.f32.partialorder %v3163_v42, 0.0  ;;  %v3162_v29 = vmul.f32 0.5, %v3158_v43 }
0x16ac   :  { %v3167_v22 = vsel %vm3165_vm10, 1.0, %v4335_v62 }
0x16ad   :  { %v3171_v45 = vmul.f32 0.3275911, %v3169_v44  ;;  %v3170_v13 = vand.u32 2147483647, %v3164_v23  ;;  %v3195_v47 = vsub.f32 0.0, %v3169_v44  ;;  %vm3166_vm11 = vcmp.ge.f32.partialorder %v3164_v23, 0.0 }
0x16ae   :  { %v3168_v37 = vsel %vm3166_vm11, 1.0, %v4335_v62 }
0x16af   :  { %v3173_v6 = vadd.f32 1.0, %v3171_v45  ;;  %v3172_v8 = vmul.f32 0.3275911, %v3170_v13  ;;  %v3196_v63 = vsub.f32 0.0, %v3170_v13  ;;  %v3197_v48 = vmul.f32 %v3195_v47, %v3169_v44 }
0x16b1   :  { %4292 = vrcp.f32 %v3173_v6  ;;  %v3174_v46 = vadd.f32 1.0, %v3172_v8  ;;  %v3198_v24 = vmul.f32 %v3196_v63, %v3170_v13  ;;  %v3199_v56 = vmul.f32 1.442695, %v3197_v48  ;;  %v4193_v63 = vld [vmem:[%s5197_s2 + $0x1b0] sm:$0xff]   ;;  %v4195_v48 = vld [vmem:[%s5197_s2 + $0x1c0] sm:$0xff]  }
0x16b2   :  { %4091 = vmatpush3.bf16.msra.mxu1 %v4193_v63 }
0x16b3   :  { %4294 = vrcp.f32 %v3174_v46  ;;  %v3201_v53 = vmul.f32 1.442695, %v3198_v24  ;;  %4092 = vmatprep.subr.bf16.mxu1 %v4328_v15 }
0x16b4   :  { %4296 = vpow2.f32 %v3199_v56 }
0x16b5   :  { %4298 = vpow2.f32 %v3201_v53 }
0x16bb   :  { %v4293_v11 = vpop.eup %4292 }
0x16bc   :  { %v3177_v50 = vmul.f32 1.0614054, %v4293_v11 }
0x16bd   :  { %v4295_v51 = vpop.eup %4294 }
0x16be   :  { %v3179_v54 = vadd.f32 -1.4531521, %v3177_v50  ;;  %v3178_v57 = vmul.f32 1.0614054, %v4295_v51  ;;  %v4297_v9 = vpop.eup %4296 }
0x16bf   :  { %v4299_v20 = vpop.eup %4298 }
0x16c0   :  { %v3181_v58 = vmul.f32 %v4293_v11, %v3179_v54  ;;  %v3180_v59 = vadd.f32 -1.4531521, %v3178_v57 }
0x16c2   :  { %v3183_v60 = vadd.f32 1.4214138, %v3181_v58  ;;  %v3182_v61 = vmul.f32 %v4295_v51, %v3180_v59  ;;  %v3586_v59 = vld [vmem:[%s5196_s1 + $0x21] ss:$0 sm:$0xff] }
0x16c4   :  { %v3185_v0 = vmul.f32 %v4293_v11, %v3183_v60  ;;  %v3184_v25 = vadd.f32 1.4214138, %v3182_v61 }
0x16c6   :  { %v3187_v17 = vadd.f32 -0.28449672, %v3185_v0  ;;  %v3186_v2 = vmul.f32 %v4295_v51, %v3184_v25 }
0x16c8   :  { %v3189_v3 = vmul.f32 %v4293_v11, %v3187_v17  ;;  %v3188_v4 = vadd.f32 -0.28449672, %v3186_v2 }
0x16ca   :  { %v3191_v7 = vadd.f32 0.2548296, %v3189_v3  ;;  %v3190_v10 = vmul.f32 %v4295_v51, %v3188_v4 }
0x16cc   :  { %v3193_v12 = vmul.f32 %v4293_v11, %v3191_v7  ;;  %v3192_v14 = vadd.f32 0.2548296, %v3190_v10  ;;  %v4194_v11 = vld [vmem:[%s5197_s2 + $0x1b8] sm:$0xff]  }
0x16cd   :  { %4093 = vmatpush3.bf16.msra.mxu1 %v4194_v11 }
0x16ce   :  { %v3203_v16 = vmul.f32 %v4297_v9, %v3193_v12  ;;  %v3194_v18 = vmul.f32 %v4295_v51, %v3192_v14  ;;  %4094 = vmatprep.subr.bf16.mxu1 %v4328_v15  ;;  %v3587_v15 = vld [vmem:[%s5196_s1 + $0x22] ss:$0 sm:$0xff] }
0x16d0   :  { %v3205_v21 = vsub.f32 1.0, %v3203_v16  ;;  %v3204_v1 = vmul.f32 %v4299_v20, %v3194_v18 }
0x16d1   :  { %4095 = vmatpush3.bf16.msra.mxu1 %v4195_v48 }
0x16d2   :  { %v3207_v26 = vmul.f32 %v3205_v21, %v3167_v22  ;;  %v3206_v27 = vsub.f32 1.0, %v3204_v1 }
0x16d4   :  { %v3209_v55 = vadd.f32 1.0, %v3207_v26  ;;  %v3208_v5 = vmul.f32 %v3206_v27, %v3168_v37 }
0x16d6   :  { %v3210_v30 = vadd.f32 1.0, %v3208_v5  ;;  %v3211_v40 = vmul.f32 %v3209_v55, %v3161_v28 }
0x16d8   :  { %v3212_v31 = vmul.f32 %v3210_v30, %v3162_v29 }
0x16da   :  { %v3225_v32 = vpack.c.bf16 %v3212_v31, %v3211_v40  ;;  %v3588_v31 = vld [vmem:[%s5196_s1 + $0x23] ss:$0 sm:$0xff] }
0x16dc   :  { %4087 = vmatmul.mubr.msk.bf16.vlgmr.msra.gmra.mrb[92].mxu0 %vm1700_vm9, %v3225_v32 }
0x17af   :  { %v3299_v33 = vpop.f32.mrb[92].mxu0 }
0x17b0   :  { %v3306_v35 = vadd.f32 %v3299_v33, %v5088_v49  ;;  %v4088_v36 = vpop.f32.mrb[93].mxu0 }
0x17b1   :  { %v3302_v39 = vpop.f32.mrb[94].mxu0 }
0x17b2   :  { %v3307_v62 = vadd.f32 %v3302_v39, %v5091_v52  ;;  %v4089_v41 = vpop.f32.mrb[95].mxu0  ;;  %v3313_v38 = vadd.f32 %v3585_v34, %v3306_v35 }
0x17b4   :  { %v3317_v42 = vsel %vm144_vm2, %v3313_v38, 0.0  ;;  %v3314_v43 = vadd.f32 %v3585_v34, %v3307_v62 }
0x17b5   :  { %3318 = vadd.xlane.f32.xlu0 %v3317_v42 }
0x17b6   :  { %v3320_v19 = vsel %vm144_vm2, %v3314_v43, 0.0 }
0x17b7   :  { %3321 = vadd.xlane.f32.xlu1 %v3320_v19 }
0x1842   :  { %v3319_v44 = vpop.xlane.xlu0 %3318 }
0x1843   :  { %v3323_v23 = vmul.f32 0.020833334, %v3319_v44 }
0x1844   :  { %v3322_v45 = vpop.xlane.xlu1 %3321 }
0x1845   :  { %v3325_v13 = vsub.f32 %v3313_v38, %v3323_v23  ;;  %v3324_v6 = vmul.f32 0.020833334, %v3322_v45 }
0x1847   :  { %v3326_v8 = vsub.f32 %v3314_v43, %v3324_v6  ;;  %v3327_v49 = vmul.f32 %v3325_v13, %v3325_v13 }
0x1849   :  { %v3329_v46 = vsel %vm144_vm2, %v3327_v49, 0.0  ;;  %v3328_v47 = vmul.f32 %v3326_v8, %v3326_v8 }
0x184a   :  { %3330 = vadd.xlane.f32.xlu0 %v3329_v46 }
0x184b   :  { %v3332_v52 = vsel %vm144_vm2, %v3328_v47, 0.0 }
0x184c   :  { %3333 = vadd.xlane.f32.xlu1 %v3332_v52 }
0x18d7   :  { %v3331_v50 = vpop.xlane.xlu0 %3330 }
0x18d8   :  { %v3335_v51 = vmul.f32 0.020833334, %v3331_v50 }
0x18d9   :  { %v3334_v54 = vpop.xlane.xlu1 %3333 }
0x18da   :  { %v3337_v24 = vadd.f32 1e-05, %v3335_v51  ;;  %v3336_v56 = vmul.f32 0.020833334, %v3334_v54 }
0x18dc   :  { %4300 = vrsqrt.f32 %v3337_v24  ;;  %v3338_v57 = vadd.f32 1e-05, %v3336_v56 }
0x18de   :  { %4302 = vrsqrt.f32 %v3338_v57 }
0x18e6   :  { %v4301_v58 = vpop.eup %4300 }
0x18e7   :  { %v3341_v60 = vmul.f32 %v4301_v58, %v3325_v13 }
0x18e8   :  { %v4303_v53 = vpop.eup %4302 }
0x18e9   :  { %v3347_v61 = vmul.f32 %v3586_v59, %v3341_v60  ;;  %v3342_v0 = vmul.f32 %v4303_v53, %v3326_v8 }
0x18eb   :  { %v3353_v25 = vadd.f32 %v3587_v15, %v3347_v61  ;;  %v3348_v17 = vmul.f32 %v3586_v59, %v3342_v0 }
0x18ed   :  { %v3355_v2 = vsel %vm144_vm2, %v3353_v25, 0.0  ;;  %v3354_v3 = vadd.f32 %v3587_v15, %v3348_v17 }
0x18ee   :  { %v3356_v4 = vrot.slane %v3355_v2, 4 }
0x18ef   :  { %v3362_v7 = vsel %vm144_vm2, %v3354_v3, 0.0 }
0x18f0   :  { %v3357_v10 = vadd.f32 %v3356_v4, %v3355_v2  ;;  %v3363_v12 = vrot.slane %v3362_v7, 4 }
0x18f2   :  { %v3358_v9 = vrot.slane %v3357_v10, 2  ;;  %v3364_v14 = vadd.f32 %v3363_v12, %v3362_v7 }
0x18f4   :  { %v3365_v16 = vrot.slane %v3364_v14, 2  ;;  %v3359_v18 = vadd.f32 %v3358_v9, %v3357_v10 }
0x18f6   :  { %v3360_v20 = vrot.slane %v3359_v18, 1  ;;  %v3366_v21 = vadd.f32 %v3365_v16, %v3364_v14 }
0x18f8   :  { %v3361_v22 = vadd.f32 %v3360_v20, %v3359_v18  ;;  %v3367_v1 = vrot.slane %v3366_v21, 1 }
0x18fa   :  { %v3368_v26 = vadd.f32 %v3367_v1, %v3366_v21  ;;  %v3370_v27 = vmul.f32 0.125, %v3361_v22 }
0x18fc   :  { %v3371_v37 = vmul.f32 0.125, %v3368_v26  ;;  %v3378_v55 = vpack.c.bf16 %v3370_v27, %v3370_v27 }
0x18fe   :  { %v3379_v5 = vpack.c.bf16 %v3371_v37, %v3371_v37  ;;  %v3387_v28 = vunpack.c.l.b16 %v3378_v55 }
0x1900   :  { %v3388_v29 = vunpack.c.l.b16 %v3379_v5 }
0x1902   :  { %v3390_v30 = vsel %vm3389_vm12, %v3388_v29, %v3387_v28 }
0x1903   :  { %v3391_v40 = vpack.c.b16 %v3390_v30, %v3390_v30 }
0x1905   :  { %4097 = vmatmul.mubr.msk.bf16.vlgmr.msra.gmra.mrb[92].mxu1 %vm144_vm2, %v3391_v40 }
0x19d8   :  { %v3447_v32 = vpop.f32.mrb[92].mxu1 }
0x19d9   :  { %v3448_v33 = vadd.f32 %v3588_v31, %v3447_v32  ;;  %v4098_v34 = vpop.f32.mrb[93].mxu1 }
0x19da   :  { %v3450_v35 = vpop.f32.mrb[94].mxu1 }
0x19db   :  { %3453 = vst [vmem:[#allocation2] sm:$0x3] %v3448_v33  ;;  %v4099_v36 = vpop.f32.mrb[95].mxu1 }
0x19dc   :  { %4315 = shalt.err (!%p4312_p4)
}
0x19dd   :  { %s4316_s1 = scalar_lea.hbm %s5198_s3, 32 }
0x19de   :  { %p4317_p5 = scmp.ne.s32.totalorder %s5198_s3, %s4316_s1  ;;  %p4320_p6 = scmp.lt.u32.totalorder %s4316_s1, %s5198_s3 }
0x19e0   :  { %p4322_p7 = pnand %p4320_p6, %p4317_p5 }
0x19e2   :  { %4325 = shalt.err (!%p4322_p7)
}
0x19e3   :  { %3463 = dma.vmem_to_hbm [thread:$0]  %s3461_s19, 32, %s5198_s3, [#allocation3]  }
0x19e4   :  { %4326 = dma.done.wait [#allocation3], 32  }
0x19e5   :  { %4327 = vsyncadd [#allocation3], 4294967264 }
0x19e6   :  { %3467 = vsyncpa [#allocation3], 1 }

</bundles_post_ra>
